<compile_context>
chip_gen: v7x
topology: tpu7x:2x2x1
jax: 0.10.0
libtpu: 0.0.40
codegen_flags: <defaults>
</compile_context>

<pallas_src>
import jax
import jax.numpy as jnp
from jax.experimental import pallas as pl
from jax.experimental.pallas import tpu as pltpu

BN_EPS = 1e-5


def conv_block_kernel(patches_ref, w_ref, gamma_ref, beta_ref, out_ref):
    # patches: (M, K) = (B*Ho*Wo, KH*KW*C_in);  w: (K, C_out)  -> conv: (M, C_out)
    patches = patches_ref[...]
    w = w_ref[...]

    # 3x3 conv (stride 1, no bias) as a single im2col GEMM on the MXU.
    # N = C_out = 256 keeps the result lane-dense.
    conv = jnp.dot(patches, w, preferred_element_type=jnp.float32)

    # Training-mode BatchNorm2d: per-channel batch stats (biased variance),
    # folded into one scale/shift so normalize + affine is a single FMA/elem.
    mean = jnp.mean(conv, axis=0, keepdims=True)                  # (1, C_out)
    centered = conv - mean
    var = jnp.mean(centered * centered, axis=0, keepdims=True)    # (1, C_out)
    scale = gamma_ref[...] * jax.lax.rsqrt(var + BN_EPS)          # (1, C_out)

    # ReLU(centered * scale + beta)  ==  ReLU((conv - mean)/std * gamma + beta)
    out_ref[...] = jnp.maximum(centered * scale + beta_ref[...], 0.0)


def conv_block_forward(x, w_conv, gamma, beta):
    """ReLU(BatchNorm2d(Conv2d(x, w_conv, k=3, s=1, bias=False))), NCHW in/out."""
    B, C_in, H, W = x.shape
    C_out, _, KH, KW = w_conv.shape
    Ho, Wo = H - KH + 1, W - KW + 1          # PyTorch Conv2d default padding=0
    M = B * Ho * Wo
    K = KH * KW * C_in

    # ---- layout plumbing only: transpose / reshape / static slices (no gather) ----
    x_nhwc = jnp.transpose(x, (0, 2, 3, 1))                          # (B, H, W, C_in)
    # im2col: feature index j = (kh*KW + kw)*C_in + ci
    patches = jnp.concatenate(
        [x_nhwc[:, kh:kh + Ho, kw:kw + Wo, :]
         for kh in range(KH) for kw in range(KW)],
        axis=-1,
    ).reshape(M, K)                                                  # (M, K)
    # Match weight column order to the patch feature order.
    w_mat = jnp.transpose(w_conv, (2, 3, 1, 0)).reshape(K, C_out)    # (K, C_out)
    gamma_k = gamma.reshape(1, C_out).astype(jnp.float32)
    beta_k = beta.reshape(1, C_out).astype(jnp.float32)

    vmem = pl.BlockSpec(memory_space=pltpu.MemorySpace.VMEM)
    out = pl.pallas_call(
        conv_block_kernel,
        out_shape=jax.ShapeDtypeStruct((M, C_out), jnp.float32),
        in_specs=[vmem] * 4,
        out_specs=vmem,
    )(patches, w_mat, gamma_k, beta_k)

    # Back to PyTorch NCHW.
    return jnp.transpose(out.reshape(B, Ho, Wo, C_out), (0, 3, 1, 2))


def ref_forward(x, w_conv, gamma, beta):
    """Pure-JAX reference mirroring the PyTorch ConvBlock forward (training-mode BN)."""
    conv = jax.lax.conv_general_dilated(
        x, w_conv, window_strides=(1, 1), padding="VALID",
        dimension_numbers=("NCHW", "OIHW", "NCHW"),
        precision=jax.lax.Precision.HIGHEST)
    mean = conv.mean(axis=(0, 2, 3), keepdims=True)
    var = ((conv - mean) ** 2).mean(axis=(0, 2, 3), keepdims=True)
    act = (conv - mean) * jax.lax.rsqrt(var + BN_EPS)
    act = act * gamma.reshape(1, -1, 1, 1) + beta.reshape(1, -1, 1, 1)
    return jnp.maximum(act, 0.0)


if __name__ == "__main__":
    B, C_in, H, W = 2, 4, 16, 16
    C_out = 256                      # ConvBlock default out_planes

    key = jax.random.PRNGKey(0)
    kx, kw = jax.random.split(key, 2)

    x = jax.random.normal(kx, (B, C_in, H, W), jnp.float32)
    w_conv = 0.1 * jax.random.normal(kw, (C_out, C_in, 3, 3), jnp.float32)
    gamma = 1.0 + 0.01 * jnp.arange(C_out, dtype=jnp.float32)
    beta = 0.005 * jnp.arange(C_out, dtype=jnp.float32)

    out = conv_block_forward(x, w_conv, gamma, beta)
    out = jax.block_until_ready(out)

    ref = ref_forward(x, w_conv, gamma, beta)
    assert out.shape == (B, C_out, H - 2, W - 2)
    assert jnp.allclose(out, ref, atol=1e-4, rtol=1e-4), "mismatch vs JAX reference"
    # ReLU output is non-negative
    assert bool(jnp.all(out >= 0.0))
    print("KERNEL_OK")
</pallas_src>

<mosaic_0001>
module attributes {stable_mosaic.version = 11 : i64} {
  func.func @conv_block_kernel(%arg0: memref<392x36xf32, #tpu.memory_space<vmem>>, %arg1: memref<36x256xf32, #tpu.memory_space<vmem>>, %arg2: memref<1x256xf32, #tpu.memory_space<vmem>>, %arg3: memref<1x256xf32, #tpu.memory_space<vmem>>, %arg4: memref<392x256xf32, #tpu.memory_space<vmem>>) attributes {dimension_semantics = [], scalar_prefetch = 0 : i64, scratch_operands = 0 : i64, tpu.core_type = #tpu.core_type<tc>} {
    %c0 = arith.constant 0 : index
    %c0_0 = arith.constant 0 : index
    %0 = vector.load %arg0[%c0, %c0_0] : memref<392x36xf32, #tpu.memory_space<vmem>>, vector<392x36xf32>
    %c0_1 = arith.constant 0 : index
    %c0_2 = arith.constant 0 : index
    %1 = vector.load %arg1[%c0_1, %c0_2] : memref<36x256xf32, #tpu.memory_space<vmem>>, vector<36x256xf32>
    %cst = arith.constant dense<0.000000e+00> : vector<392x256xf32>
    %2 = tpu.matmul %0, %1, %cst {dimension_numbers = #tpu.dot_dimension_numbers<[1], [0], [0], [1], [0, 0, 1, 1], [], []>} : vector<392x36xf32>, vector<36x256xf32>, vector<392x256xf32> -> vector<392x256xf32>
    %cst_3 = arith.constant dense<0.000000e+00> : vector<256xf32>
    %3 = vector.multi_reduction <add>, %2, %cst_3 [0] : vector<392x256xf32> to vector<256xf32>
    %4 = vector.shape_cast %3 : vector<256xf32> to vector<1x256xf32>
    %cst_4 = arith.constant 3.920000e+02 : f32
    %5 = vector.broadcast %cst_4 : f32 to vector<1x256xf32>
    %6 = arith.divf %4, %5 : vector<1x256xf32>
    %7 = vector.broadcast %6 : vector<1x256xf32> to vector<392x256xf32>
    %8 = arith.subf %2, %7 : vector<392x256xf32>
    %9 = arith.mulf %8, %8 : vector<392x256xf32>
    %cst_5 = arith.constant dense<0.000000e+00> : vector<256xf32>
    %10 = vector.multi_reduction <add>, %9, %cst_5 [0] : vector<392x256xf32> to vector<256xf32>
    %11 = vector.shape_cast %10 : vector<256xf32> to vector<1x256xf32>
    %cst_6 = arith.constant 3.920000e+02 : f32
    %12 = vector.broadcast %cst_6 : f32 to vector<1x256xf32>
    %13 = arith.divf %11, %12 : vector<1x256xf32>
    %c0_7 = arith.constant 0 : index
    %c0_8 = arith.constant 0 : index
    %14 = vector.load %arg2[%c0_7, %c0_8] : memref<1x256xf32, #tpu.memory_space<vmem>>, vector<1x256xf32>
    %cst_9 = arith.constant 9.99999974E-6 : f32
    %15 = vector.broadcast %cst_9 : f32 to vector<1x256xf32>
    %16 = arith.addf %13, %15 : vector<1x256xf32>
    %17 = math.rsqrt %16 : vector<1x256xf32>
    %18 = arith.mulf %14, %17 : vector<1x256xf32>
    %19 = vector.broadcast %18 : vector<1x256xf32> to vector<392x256xf32>
    %20 = arith.mulf %8, %19 : vector<392x256xf32>
    %c0_10 = arith.constant 0 : index
    %c0_11 = arith.constant 0 : index
    %21 = vector.load %arg3[%c0_10, %c0_11] : memref<1x256xf32, #tpu.memory_space<vmem>>, vector<1x256xf32>
    %22 = vector.broadcast %21 : vector<1x256xf32> to vector<392x256xf32>
    %23 = arith.addf %20, %22 : vector<392x256xf32>
    %cst_12 = arith.constant 0.000000e+00 : f32
    %24 = vector.broadcast %cst_12 : f32 to vector<392x256xf32>
    %25 = arith.maximumf %23, %24 : vector<392x256xf32>
    %c0_13 = arith.constant 0 : index
    %c0_14 = arith.constant 0 : index
    %26 = vector.load %arg4[%c0_13, %c0_14] : memref<392x256xf32, #tpu.memory_space<vmem>>, vector<392x256xf32>
    tpu.vector_store %arg4[%c0_13, %c0_14], %25 {strides = array<i32>} : memref<392x256xf32, #tpu.memory_space<vmem>>, vector<392x256xf32>,
    return
  }
}

</mosaic_0001>

<bundles_post_ra>
// kernel: tpu_custom_call.1
= control target key start
LH: loop header
LB: loop body
LE: loop exit
PB: predicated region body
PF: predicated region fallthrough
CT: control target
= control target key end

     0   :  { %v1561_v7 = vmov 0.0   ;;  %vm225_vm0 = vcmask 1043456   ;;  %vm77_vm1 = vcmask 293888   ;;  %s3610_s0 = inlined_call_operand.vmem [shape: f32[392,36], index: 0, kind: input, shape index: {}]   ;;  %s3611_s1 = inlined_call_operand.vmem [shape: f32[36,256], index: 1, kind: input, shape index: {}]   ;;  %s3612_s2 = inlined_call_operand.vmem [shape: f32[1,256], index: 2, kind: input, shape index: {}]   ;;  %s3613_s3 = inlined_call_operand.vmem [shape: f32[1,256], index: 3, kind: input, shape index: {}]   ;;  %s3614_s4 = inlined_call_operand.hbm [shape: f32[392,256], index: 4, kind: output, shape index: {}]  }
   0x1   :  { %v68_v0 = vld [vmem:[%s3611_s1 + $0x8] sm:$0xff]  ;;  %v70_v1 = vld [vmem:[%s3611_s1 + $0x18] sm:$0xff]  ;;  %v67_v2 = vld [vmem:[%s3611_s1] sm:$0xff]  ;;  %296 = vmatprep.mubr.f32.mxu0 %v1561_v7  ;;  %446 = vmatprep.mubr.f32.mxu1 %v1561_v7 }
   0x2   :  { %v1514_v3 = vpack.c.bf16 %v70_v1, %v68_v0  ;;  %v69_v4 = vld [vmem:[%s3611_s1 + $0x10] sm:$0xff]  ;;  %v72_v5 = vld [vmem:[%s3611_s1 + $0x28] sm:$0xff]  ;;  %v74_v6 = vld [vmem:[%s3611_s1 + $0x38] sm:$0xff] }
   0x3   :  { %v1516_v8 = vpack.c.bf16 %v69_v4, %v67_v2  ;;  %v1518_v9 = vpack.c.bf16 %v74_v6, %v72_v5  ;;  %v71_v10 = vld [vmem:[%s3611_s1 + $0x20] sm:$0xff]  ;;  %v73_v11 = vld [vmem:[%s3611_s1 + $0x30] sm:$0xff]  ;;  %v76_v13 = vld [vmem:[%s3611_s1 + $0x48] sm:$0xf] }
   0x4   :  { %1515 = vmatprep.subr.bf16.mxu0 %v1514_v3  ;;  %1522 = vmatprep.subr.bf16.mxu1 %v1514_v3  ;;  %v1520_v12 = vpack.c.bf16 %v73_v11, %v71_v10  ;;  %v75_v14 = vld [vmem:[%s3611_s1 + $0x40] sm:$0xf]  ;;  %v43_v16 = vld [vmem:[%s3610_s0 + $0xc8] sm:$0xff]  ;;  %v44_v18 = vld [vmem:[%s3610_s0 + $0xd0] sm:$0xff] }
   0x5   :  { %1517 = vmatpush1.bf16.msra.mxu0 %v1516_v8  ;;  %1525 = vmatpush1.bf16.msra.mxu1 %v1516_v8  ;;  %v18_v15 = vld [vmem:[%s3610_s0] sm:$0xff]  ;;  %v19_v17 = vld [vmem:[%s3610_s0 + $0x8] sm:$0xff]  ;;  %v20_v19 = vld [vmem:[%s3610_s0 + $0x10] sm:$0xff] }
   0x6   :  { %1519 = vmatprep.subr.bf16.mxu0 %v1518_v9  ;;  %1523 = vmatprep.subr.bf16.mxu1 %v1518_v9  ;;  %v45_v20 = vld [vmem:[%s3610_s0 + $0xd8] sm:$0xff] }
   0x9   :  { %1521 = vmatpush1.bf16.msra.mxu0 %v1520_v12  ;;  %1526 = vmatpush1.bf16.msra.mxu1 %v1520_v12 }
   0xa   :  { %1463 = vmatprep.subr.msk.mxu0 %vm225_vm0, %v76_v13  ;;  %1524 = vmatprep.subr.msk.mxu1 %vm225_vm0, %v76_v13 }
   0xd   :  { %1464 = vmatpush1.msk.msra.mxu0 %vm225_vm0, %v75_v14  ;;  %1527 = vmatpush1.msk.msra.mxu1 %vm225_vm0, %v75_v14 }
   0xe   :  { %1465 = vmatmul.mubr.msk.f32.vlgmr.msra.gmra.mrb[0].mxu0 %vm77_vm1, %v18_v15  ;;  %1490 = vmatmul.mubr.msk.f32.vlgmr.msra.gmra.mrb[0].mxu1 %vm77_vm1, %v43_v16 }
   0xf   :  { %302 = vmatprep.mubr.f32.mxu0 %v1561_v7  ;;  %452 = vmatprep.mubr.f32.mxu1 %v1561_v7 }
  0x12   :  { %1466 = vmatmul.mubr.msk.f32.gmra.mrb[2].mxu0 %vm77_vm1, %v19_v17  ;;  %1491 = vmatmul.mubr.msk.f32.gmra.mrb[2].mxu1 %vm77_vm1, %v44_v18 }
  0x13   :  { %308 = vmatprep.mubr.f32.mxu0 %v1561_v7  ;;  %458 = vmatprep.mubr.f32.mxu1 %v1561_v7 }
  0x14   :  { %9 = vsyncpa [#allocation3], 0  ;;  %v21_v21 = vld [vmem:[%s3610_s0 + $0x18] sm:$0xff]  ;;  %v46_v22 = vld [vmem:[%s3610_s0 + $0xe0] sm:$0xff] }
  0x15   :  { %v22_v23 = vld [vmem:[%s3610_s0 + $0x20] sm:$0xff]  ;;  %v47_v24 = vld [vmem:[%s3610_s0 + $0xe8] sm:$0xff]  ;;  %v48_v26 = vld [vmem:[%s3610_s0 + $0xf0] sm:$0xff] }
  0x16   :  { %1467 = vmatmul.mubr.msk.f32.gmra.mrb[4].mxu0 %vm77_vm1, %v20_v19  ;;  %1492 = vmatmul.mubr.msk.f32.gmra.mrb[4].mxu1 %vm77_vm1, %v45_v20  ;;  %v23_v25 = vld [vmem:[%s3610_s0 + $0x28] sm:$0xff]  ;;  %v24_v27 = vld [vmem:[%s3610_s0 + $0x30] sm:$0xff]  ;;  %v49_v28 = vld [vmem:[%s3610_s0 + $0xf8] sm:$0xff] }
  0x17   :  { %314 = vmatprep.mubr.f32.mxu0 %v1561_v7  ;;  %464 = vmatprep.mubr.f32.mxu1 %v1561_v7  ;;  %v25_v29 = vld [vmem:[%s3610_s0 + $0x38] sm:$0xff]  ;;  %v50_v30 = vld [vmem:[%s3610_s0 + $0x100] sm:$0xff]  ;;  %v51_v32 = vld [vmem:[%s3610_s0 + $0x108] sm:$0xff] }
  0x18   :  { %v26_v31 = vld [vmem:[%s3610_s0 + $0x40] sm:$0xff]  ;;  %v27_v33 = vld [vmem:[%s3610_s0 + $0x48] sm:$0xff]  ;;  %v52_v34 = vld [vmem:[%s3610_s0 + $0x110] sm:$0xff] }
  0x19   :  { %v28_v35 = vld [vmem:[%s3610_s0 + $0x50] sm:$0xff]  ;;  %v53_v36 = vld [vmem:[%s3610_s0 + $0x118] sm:$0xff]  ;;  %v54_v38 = vld [vmem:[%s3610_s0 + $0x120] sm:$0xff] }
  0x1a   :  { %1468 = vmatmul.mubr.msk.f32.gmra.mrb[6].mxu0 %vm77_vm1, %v21_v21  ;;  %1493 = vmatmul.mubr.msk.f32.gmra.mrb[6].mxu1 %vm77_vm1, %v46_v22  ;;  %v29_v37 = vld [vmem:[%s3610_s0 + $0x58] sm:$0xff]  ;;  %v30_v39 = vld [vmem:[%s3610_s0 + $0x60] sm:$0xff]  ;;  %v55_v40 = vld [vmem:[%s3610_s0 + $0x128] sm:$0xff] }
  0x1b   :  { %320 = vmatprep.mubr.f32.mxu0 %v1561_v7  ;;  %470 = vmatprep.mubr.f32.mxu1 %v1561_v7  ;;  %v31_v41 = vld [vmem:[%s3610_s0 + $0x68] sm:$0xff]  ;;  %v56_v42 = vld [vmem:[%s3610_s0 + $0x130] sm:$0xff]  ;;  %v57_v44 = vld [vmem:[%s3610_s0 + $0x138] sm:$0xff] }
  0x1c   :  { %v32_v43 = vld [vmem:[%s3610_s0 + $0x70] sm:$0xff]  ;;  %v33_v45 = vld [vmem:[%s3610_s0 + $0x78] sm:$0xff]  ;;  %v58_v46 = vld [vmem:[%s3610_s0 + $0x140] sm:$0xff] }
  0x1d   :  { %v34_v47 = vld [vmem:[%s3610_s0 + $0x80] sm:$0xff]  ;;  %v59_v48 = vld [vmem:[%s3610_s0 + $0x148] sm:$0xff]  ;;  %v60_v50 = vld [vmem:[%s3610_s0 + $0x150] sm:$0xff] }
  0x1e   :  { %1469 = vmatmul.mubr.msk.f32.gmra.mrb[8].mxu0 %vm77_vm1, %v22_v23  ;;  %1494 = vmatmul.mubr.msk.f32.gmra.mrb[8].mxu1 %vm77_vm1, %v47_v24  ;;  %v35_v49 = vld [vmem:[%s3610_s0 + $0x88] sm:$0xff]  ;;  %v36_v51 = vld [vmem:[%s3610_s0 + $0x90] sm:$0xff]  ;;  %v61_v52 = vld [vmem:[%s3610_s0 + $0x158] sm:$0xff] }
  0x1f   :  { %326 = vmatprep.mubr.f32.mxu0 %v1561_v7  ;;  %476 = vmatprep.mubr.f32.mxu1 %v1561_v7  ;;  %v37_v53 = vld [vmem:[%s3610_s0 + $0x98] sm:$0xff]  ;;  %v62_v54 = vld [vmem:[%s3610_s0 + $0x160] sm:$0xff]  ;;  %v63_v56 = vld [vmem:[%s3610_s0 + $0x168] sm:$0xff] }
  0x20   :  { %v38_v55 = vld [vmem:[%s3610_s0 + $0xa0] sm:$0xff]  ;;  %v39_v57 = vld [vmem:[%s3610_s0 + $0xa8] sm:$0xff]  ;;  %v64_v58 = vld [vmem:[%s3610_s0 + $0x170] sm:$0xff] }
  0x21   :  { %v40_v59 = vld [vmem:[%s3610_s0 + $0xb0] sm:$0xff]  ;;  %v65_v60 = vld [vmem:[%s3610_s0 + $0x178] sm:$0xff]  ;;  %v66_v62 = vld [vmem:[%s3610_s0 + $0x180] sm:$0xff] }
  0x22   :  { %1470 = vmatmul.mubr.msk.f32.gmra.mrb[10].mxu0 %vm77_vm1, %v23_v25  ;;  %1495 = vmatmul.mubr.msk.f32.gmra.mrb[10].mxu1 %vm77_vm1, %v48_v26  ;;  %v41_v61 = vld [vmem:[%s3610_s0 + $0xb8] sm:$0xff]  ;;  %v42_v63 = vld [vmem:[%s3610_s0 + $0xc0] sm:$0xff] }
  0x23   :  { %332 = vmatprep.mubr.f32.mxu0 %v1561_v7  ;;  %482 = vmatprep.mubr.f32.mxu1 %v1561_v7 }
  0x26   :  { %1471 = vmatmul.mubr.msk.f32.gmra.mrb[12].mxu0 %vm77_vm1, %v24_v27  ;;  %1496 = vmatmul.mubr.msk.f32.gmra.mrb[12].mxu1 %vm77_vm1, %v49_v28 }
  0x27   :  { %338 = vmatprep.mubr.f32.mxu0 %v1561_v7  ;;  %488 = vmatprep.mubr.f32.mxu1 %v1561_v7 }
  0x2a   :  { %1472 = vmatmul.mubr.msk.f32.gmra.mrb[14].mxu0 %vm77_vm1, %v25_v29  ;;  %1497 = vmatmul.mubr.msk.f32.gmra.mrb[14].mxu1 %vm77_vm1, %v50_v30 }
  0x2b   :  { %344 = vmatprep.mubr.f32.mxu0 %v1561_v7  ;;  %494 = vmatprep.mubr.f32.mxu1 %v1561_v7 }
  0x2e   :  { %1473 = vmatmul.mubr.msk.f32.gmra.mrb[16].mxu0 %vm77_vm1, %v26_v31  ;;  %1498 = vmatmul.mubr.msk.f32.gmra.mrb[16].mxu1 %vm77_vm1, %v51_v32 }
  0x2f   :  { %350 = vmatprep.mubr.f32.mxu0 %v1561_v7  ;;  %500 = vmatprep.mubr.f32.mxu1 %v1561_v7 }
  0x32   :  { %1474 = vmatmul.mubr.msk.f32.gmra.mrb[18].mxu0 %vm77_vm1, %v27_v33  ;;  %1499 = vmatmul.mubr.msk.f32.gmra.mrb[18].mxu1 %vm77_vm1, %v52_v34 }
  0x33   :  { %356 = vmatprep.mubr.f32.mxu0 %v1561_v7  ;;  %506 = vmatprep.mubr.f32.mxu1 %v1561_v7 }
  0x36   :  { %1475 = vmatmul.mubr.msk.f32.gmra.mrb[20].mxu0 %vm77_vm1, %v28_v35  ;;  %1500 = vmatmul.mubr.msk.f32.gmra.mrb[20].mxu1 %vm77_vm1, %v53_v36 }
  0x37   :  { %362 = vmatprep.mubr.f32.mxu0 %v1561_v7  ;;  %512 = vmatprep.mubr.f32.mxu1 %v1561_v7 }
  0x3a   :  { %1476 = vmatmul.mubr.msk.f32.gmra.mrb[22].mxu0 %vm77_vm1, %v29_v37  ;;  %1501 = vmatmul.mubr.msk.f32.gmra.mrb[22].mxu1 %vm77_vm1, %v54_v38 }
  0x3b   :  { %368 = vmatprep.mubr.f32.mxu0 %v1561_v7  ;;  %518 = vmatprep.mubr.f32.mxu1 %v1561_v7 }
  0x3e   :  { %1477 = vmatmul.mubr.msk.f32.gmra.mrb[24].mxu0 %vm77_vm1, %v30_v39  ;;  %1502 = vmatmul.mubr.msk.f32.gmra.mrb[24].mxu1 %vm77_vm1, %v55_v40 }
  0x3f   :  { %374 = vmatprep.mubr.f32.mxu0 %v1561_v7  ;;  %524 = vmatprep.mubr.f32.mxu1 %v1561_v7 }
  0x42   :  { %1478 = vmatmul.mubr.msk.f32.gmra.mrb[26].mxu0 %vm77_vm1, %v31_v41  ;;  %1503 = vmatmul.mubr.msk.f32.gmra.mrb[26].mxu1 %vm77_vm1, %v56_v42 }
  0x43   :  { %380 = vmatprep.mubr.f32.mxu0 %v1561_v7  ;;  %530 = vmatprep.mubr.f32.mxu1 %v1561_v7 }
  0x46   :  { %1479 = vmatmul.mubr.msk.f32.gmra.mrb[28].mxu0 %vm77_vm1, %v32_v43  ;;  %1504 = vmatmul.mubr.msk.f32.gmra.mrb[28].mxu1 %vm77_vm1, %v57_v44 }
  0x47   :  { %386 = vmatprep.mubr.f32.mxu0 %v1561_v7  ;;  %536 = vmatprep.mubr.f32.mxu1 %v1561_v7 }
  0x4a   :  { %1480 = vmatmul.mubr.msk.f32.gmra.mrb[30].mxu0 %vm77_vm1, %v33_v45  ;;  %1505 = vmatmul.mubr.msk.f32.gmra.mrb[30].mxu1 %vm77_vm1, %v58_v46 }
  0x4b   :  { %392 = vmatprep.mubr.f32.mxu0 %v1561_v7  ;;  %542 = vmatprep.mubr.f32.mxu1 %v1561_v7 }
  0x4e   :  { %1481 = vmatmul.mubr.msk.f32.gmra.mrb[32].mxu0 %vm77_vm1, %v34_v47  ;;  %1506 = vmatmul.mubr.msk.f32.gmra.mrb[32].mxu1 %vm77_vm1, %v59_v48 }
  0x4f   :  { %398 = vmatprep.mubr.f32.mxu0 %v1561_v7  ;;  %548 = vmatprep.mubr.f32.mxu1 %v1561_v7 }
  0x52   :  { %1482 = vmatmul.mubr.msk.f32.gmra.mrb[34].mxu0 %vm77_vm1, %v35_v49  ;;  %1507 = vmatmul.mubr.msk.f32.gmra.mrb[34].mxu1 %vm77_vm1, %v60_v50 }
  0x53   :  { %404 = vmatprep.mubr.f32.mxu0 %v1561_v7  ;;  %554 = vmatprep.mubr.f32.mxu1 %v1561_v7 }
  0x56   :  { %1483 = vmatmul.mubr.msk.f32.gmra.mrb[36].mxu0 %vm77_vm1, %v36_v51  ;;  %1508 = vmatmul.mubr.msk.f32.gmra.mrb[36].mxu1 %vm77_vm1, %v61_v52 }
  0x57   :  { %410 = vmatprep.mubr.f32.mxu0 %v1561_v7  ;;  %560 = vmatprep.mubr.f32.mxu1 %v1561_v7 }
  0x5a   :  { %1484 = vmatmul.mubr.msk.f32.gmra.mrb[38].mxu0 %vm77_vm1, %v37_v53  ;;  %1509 = vmatmul.mubr.msk.f32.gmra.mrb[38].mxu1 %vm77_vm1, %v62_v54 }
  0x5b   :  { %416 = vmatprep.mubr.f32.mxu0 %v1561_v7  ;;  %566 = vmatprep.mubr.f32.mxu1 %v1561_v7 }
  0x5e   :  { %1485 = vmatmul.mubr.msk.f32.gmra.mrb[40].mxu0 %vm77_vm1, %v38_v55  ;;  %1510 = vmatmul.mubr.msk.f32.gmra.mrb[40].mxu1 %vm77_vm1, %v63_v56 }
  0x5f   :  { %422 = vmatprep.mubr.f32.mxu0 %v1561_v7  ;;  %572 = vmatprep.mubr.f32.mxu1 %v1561_v7 }
  0x62   :  { %1486 = vmatmul.mubr.msk.f32.gmra.mrb[42].mxu0 %vm77_vm1, %v39_v57  ;;  %1511 = vmatmul.mubr.msk.f32.gmra.mrb[42].mxu1 %vm77_vm1, %v64_v58 }
  0x63   :  { %428 = vmatprep.mubr.f32.mxu0 %v1561_v7  ;;  %578 = vmatprep.mubr.f32.mxu1 %v1561_v7 }
  0x66   :  { %1487 = vmatmul.mubr.msk.f32.gmra.mrb[44].mxu0 %vm77_vm1, %v40_v59  ;;  %1512 = vmatmul.mubr.msk.f32.gmra.mrb[44].mxu1 %vm77_vm1, %v65_v60 }
  0x67   :  { %434 = vmatprep.mubr.f32.mxu0 %v1561_v7  ;;  %584 = vmatprep.mubr.f32.mxu1 %v1561_v7 }
  0x6a   :  { %1488 = vmatmul.mubr.msk.f32.gmra.mrb[46].mxu0 %vm77_vm1, %v41_v61  ;;  %1513 = vmatmul.mubr.msk.f32.gmra.mrb[46].mxu1 %vm77_vm1, %v66_v62 }
  0x6b   :  { %440 = vmatprep.mubr.f32.mxu0 %v1561_v7 }
  0x6e   :  { %1489 = vmatmul.mubr.msk.f32.gmra.mrb[48].mxu0 %vm77_vm1, %v42_v63 }
  0xe1   :  { %v1866_v0 = vpop.f32.mrb[0].mxu0  ;;  %v1868_v1 = vpop.f32.mrb[0].mxu1 }
  0xe2   :  { %v1870_v2 = vpop.f32.mrb[1].mxu0  ;;  %v1872_v3 = vpop.f32.mrb[1].mxu1 }
  0xe3   :  { %3731 = vst [vmem:[#allocation5_spill] sm:$0xff] %v1870_v2 }
  0xe5   :  { %v1874_v4 = vpop.f32.mrb[2].mxu0  ;;  %v1876_v5 = vpop.f32.mrb[2].mxu1 }
  0xe6   :  { %v591_v6 = vadd.f32 %v1874_v4, %v1866_v0  ;;  %v1880_v7 = vpop.f32.mrb[3].mxu0  ;;  %v1882_v8 = vpop.f32.mrb[3].mxu1 }
  0xe7   :  { %3732 = vst [vmem:[#allocation6_spill] sm:$0xff] %v1880_v7  ;;  %v645_v9 = vadd.f32 %v1880_v7, %v1870_v2 }
  0xe9   :  { %v1886_v10 = vpop.f32.mrb[4].mxu0  ;;  %v1888_v11 = vpop.f32.mrb[4].mxu1 }
  0xea   :  { %v592_v12 = vadd.f32 %v591_v6, %v1886_v10  ;;  %v1891_v13 = vpop.f32.mrb[5].mxu0  ;;  %v1893_v14 = vpop.f32.mrb[5].mxu1 }
  0xeb   :  { %3733 = vst [vmem:[#allocation7_spill] sm:$0xff] %v1891_v13  ;;  %v646_v15 = vadd.f32 %v645_v9, %v1891_v13 }
  0xed   :  { %v1896_v16 = vpop.f32.mrb[6].mxu0  ;;  %v1898_v17 = vpop.f32.mrb[6].mxu1 }
  0xee   :  { %3734 = vst [vmem:[#allocation8_spill] sm:$0xff] %v1896_v16  ;;  %v593_v18 = vadd.f32 %v592_v12, %v1896_v16  ;;  %v1901_v19 = vpop.f32.mrb[7].mxu0  ;;  %v1903_v20 = vpop.f32.mrb[7].mxu1 }
  0xef   :  { %3735 = vst [vmem:[#allocation9_spill] sm:$0xff] %v1901_v19  ;;  %v647_v21 = vadd.f32 %v646_v15, %v1901_v19 }
  0xf1   :  { %v1906_v22 = vpop.f32.mrb[8].mxu0  ;;  %v1908_v23 = vpop.f32.mrb[8].mxu1 }
  0xf2   :  { %3736 = vst [vmem:[#allocation10_spill] sm:$0xff] %v1906_v22  ;;  %v594_v24 = vadd.f32 %v593_v18, %v1906_v22  ;;  %v1911_v25 = vpop.f32.mrb[9].mxu0  ;;  %v1913_v26 = vpop.f32.mrb[9].mxu1 }
  0xf3   :  { %3737 = vst [vmem:[#allocation11_spill] sm:$0xff] %v1911_v25  ;;  %v648_v27 = vadd.f32 %v647_v21, %v1911_v25 }
  0xf5   :  { %v1916_v28 = vpop.f32.mrb[10].mxu0  ;;  %v1918_v29 = vpop.f32.mrb[10].mxu1 }
  0xf6   :  { %3738 = vst [vmem:[#allocation12_spill] sm:$0xff] %v1916_v28  ;;  %v595_v30 = vadd.f32 %v594_v24, %v1916_v28  ;;  %v1921_v31 = vpop.f32.mrb[11].mxu0  ;;  %v1923_v32 = vpop.f32.mrb[11].mxu1 }
  0xf7   :  { %3739 = vst [vmem:[#allocation13_spill] sm:$0xff] %v1921_v31  ;;  %v649_v33 = vadd.f32 %v648_v27, %v1921_v31 }
  0xf9   :  { %v1926_v34 = vpop.f32.mrb[12].mxu0  ;;  %v1928_v35 = vpop.f32.mrb[12].mxu1 }
  0xfa   :  { %3740 = vst [vmem:[#allocation14_spill] sm:$0xff] %v1926_v34  ;;  %v596_v36 = vadd.f32 %v595_v30, %v1926_v34  ;;  %v1931_v37 = vpop.f32.mrb[13].mxu0  ;;  %v1933_v38 = vpop.f32.mrb[13].mxu1 }
  0xfb   :  { %3741 = vst [vmem:[#allocation15_spill] sm:$0xff] %v1931_v37  ;;  %v650_v39 = vadd.f32 %v649_v33, %v1931_v37 }
  0xfd   :  { %v1936_v40 = vpop.f32.mrb[14].mxu0  ;;  %v1938_v41 = vpop.f32.mrb[14].mxu1 }
  0xfe   :  { %3742 = vst [vmem:[#allocation16_spill] sm:$0xff] %v1936_v40  ;;  %v597_v42 = vadd.f32 %v596_v36, %v1936_v40  ;;  %v1941_v43 = vpop.f32.mrb[15].mxu0  ;;  %v1943_v44 = vpop.f32.mrb[15].mxu1 }
  0xff   :  { %3743 = vst [vmem:[#allocation17_spill] sm:$0xff] %v1941_v43  ;;  %v651_v45 = vadd.f32 %v650_v39, %v1941_v43 }
 0x101   :  { %v1946_v46 = vpop.f32.mrb[16].mxu0  ;;  %v1948_v47 = vpop.f32.mrb[16].mxu1 }
 0x102   :  { %3744 = vst [vmem:[#allocation18_spill] sm:$0xff] %v1946_v46  ;;  %v598_v48 = vadd.f32 %v597_v42, %v1946_v46  ;;  %v1951_v49 = vpop.f32.mrb[17].mxu0  ;;  %v1953_v50 = vpop.f32.mrb[17].mxu1 }
 0x103   :  { %3745 = vst [vmem:[#allocation19_spill] sm:$0xff] %v1951_v49  ;;  %v652_v51 = vadd.f32 %v651_v45, %v1951_v49 }
 0x105   :  { %v1956_v52 = vpop.f32.mrb[18].mxu0  ;;  %v1958_v53 = vpop.f32.mrb[18].mxu1 }
 0x106   :  { %3746 = vst [vmem:[#allocation20_spill] sm:$0xff] %v1956_v52  ;;  %v599_v54 = vadd.f32 %v598_v48, %v1956_v52  ;;  %v1961_v55 = vpop.f32.mrb[19].mxu0  ;;  %v1963_v56 = vpop.f32.mrb[19].mxu1 }
 0x107   :  { %3747 = vst [vmem:[#allocation21_spill] sm:$0xff] %v1961_v55  ;;  %v653_v57 = vadd.f32 %v652_v51, %v1961_v55 }
 0x109   :  { %v1966_v58 = vpop.f32.mrb[20].mxu0  ;;  %v1968_v59 = vpop.f32.mrb[20].mxu1 }
 0x10a   :  { %3748 = vst [vmem:[#allocation22_spill] sm:$0xff] %v1966_v58  ;;  %v600_v60 = vadd.f32 %v599_v54, %v1966_v58  ;;  %v1971_v61 = vpop.f32.mrb[21].mxu0  ;;  %v1973_v62 = vpop.f32.mrb[21].mxu1 }
 0x10b   :  { %3749 = vst [vmem:[#allocation23_spill] sm:$0xff] %v1971_v61  ;;  %v654_v63 = vadd.f32 %v653_v57, %v1971_v61 }
 0x10d   :  { %v1976_v6 = vpop.f32.mrb[22].mxu0  ;;  %v1978_v9 = vpop.f32.mrb[22].mxu1 }
 0x10e   :  { %3750 = vst [vmem:[#allocation24_spill] sm:$0xff] %v1976_v6  ;;  %v601_v12 = vadd.f32 %v600_v60, %v1976_v6  ;;  %v1981_v15 = vpop.f32.mrb[23].mxu0  ;;  %v1983_v18 = vpop.f32.mrb[23].mxu1 }
 0x10f   :  { %3751 = vst [vmem:[#allocation25_spill] sm:$0xff] %v1981_v15  ;;  %v655_v21 = vadd.f32 %v654_v63, %v1981_v15 }
 0x111   :  { %v1986_v24 = vpop.f32.mrb[24].mxu0  ;;  %v1988_v27 = vpop.f32.mrb[24].mxu1 }
 0x112   :  { %3752 = vst [vmem:[#allocation26_spill] sm:$0xff] %v1986_v24  ;;  %v602_v30 = vadd.f32 %v601_v12, %v1986_v24  ;;  %v1991_v33 = vpop.f32.mrb[25].mxu0  ;;  %v1993_v36 = vpop.f32.mrb[25].mxu1 }
 0x113   :  { %3753 = vst [vmem:[#allocation27_spill] sm:$0xff] %v1991_v33  ;;  %v656_v39 = vadd.f32 %v655_v21, %v1991_v33 }
 0x115   :  { %v1996_v42 = vpop.f32.mrb[26].mxu0  ;;  %v1998_v45 = vpop.f32.mrb[26].mxu1 }
 0x116   :  { %3754 = vst [vmem:[#allocation28_spill] sm:$0xff] %v1996_v42  ;;  %v603_v48 = vadd.f32 %v602_v30, %v1996_v42  ;;  %v2001_v51 = vpop.f32.mrb[27].mxu0  ;;  %v2003_v54 = vpop.f32.mrb[27].mxu1 }
 0x117   :  { %3755 = vst [vmem:[#allocation29_spill] sm:$0xff] %v2001_v51  ;;  %v657_v57 = vadd.f32 %v656_v39, %v2001_v51 }
 0x119   :  { %v2006_v60 = vpop.f32.mrb[28].mxu0  ;;  %v2008_v63 = vpop.f32.mrb[28].mxu1 }
 0x11a   :  { %3756 = vst [vmem:[#allocation30_spill] sm:$0xff] %v2006_v60  ;;  %v604_v12 = vadd.f32 %v603_v48, %v2006_v60  ;;  %v2011_v15 = vpop.f32.mrb[29].mxu0  ;;  %v2013_v21 = vpop.f32.mrb[29].mxu1 }
 0x11b   :  { %3757 = vst [vmem:[#allocation31_spill] sm:$0xff] %v2011_v15  ;;  %3758 = vst [vmem:[#allocation32_spill] sm:$0xff] %v2013_v21  ;;  %v658_v33 = vadd.f32 %v657_v57, %v2011_v15 }
 0x11d   :  { %v2016_v61 = vpop.f32.mrb[30].mxu0  ;;  %v2018_v30 = vpop.f32.mrb[30].mxu1 }
 0x11e   :  { %3759 = vst [vmem:[#allocation33_spill] sm:$0xff] %v2016_v61  ;;  %v605_v55 = vadd.f32 %v604_v12, %v2016_v61  ;;  %v2021_v49 = vpop.f32.mrb[31].mxu0  ;;  %v2023_v39 = vpop.f32.mrb[31].mxu1 }
 0x11f   :  { %3760 = vst [vmem:[#allocation34_spill] sm:$0xff] %v2021_v49  ;;  %3761 = vst [vmem:[#allocation35_spill] sm:$0xff] %v2023_v39  ;;  %v659_v51 = vadd.f32 %v658_v33, %v2021_v49 }
 0x121   :  { %v2026_v43 = vpop.f32.mrb[32].mxu0  ;;  %v2028_v48 = vpop.f32.mrb[32].mxu1 }
 0x122   :  { %3762 = vst [vmem:[#allocation36_spill] sm:$0xff] %v2026_v43  ;;  %v606_v37 = vadd.f32 %v605_v55, %v2026_v43  ;;  %v2031_v31 = vpop.f32.mrb[33].mxu0  ;;  %v2033_v57 = vpop.f32.mrb[33].mxu1 }
 0x123   :  { %3763 = vst [vmem:[#allocation37_spill] sm:$0xff] %v2031_v31  ;;  %3764 = vst [vmem:[#allocation38_spill] sm:$0xff] %v2033_v57  ;;  %v660_v15 = vadd.f32 %v659_v51, %v2031_v31 }
 0x125   :  { %v2036_v25 = vpop.f32.mrb[34].mxu0  ;;  %v2038_v12 = vpop.f32.mrb[34].mxu1 }
 0x126   :  { %3765 = vst [vmem:[#allocation39_spill] sm:$0xff] %v2036_v25  ;;  %v607_v19 = vadd.f32 %v606_v37, %v2036_v25  ;;  %v2041_v13 = vpop.f32.mrb[35].mxu0  ;;  %v2043_v33 = vpop.f32.mrb[35].mxu1 }
 0x127   :  { %3766 = vst [vmem:[#allocation40_spill] sm:$0xff] %v2041_v13  ;;  %3767 = vst [vmem:[#allocation41_spill] sm:$0xff] %v2043_v33  ;;  %v661_v49 = vadd.f32 %v660_v15, %v2041_v13 }
 0x129   :  { %v2046_v7 = vpop.f32.mrb[36].mxu0  ;;  %v2048_v55 = vpop.f32.mrb[36].mxu1 }
 0x12a   :  { %3768 = vst [vmem:[#allocation42_spill] sm:$0xff] %v2046_v7  ;;  %v608_v2 = vadd.f32 %v607_v19, %v2046_v7  ;;  %v2051_v43 = vpop.f32.mrb[37].mxu0  ;;  %v2053_v51 = vpop.f32.mrb[37].mxu1 }
 0x12b   :  { %3769 = vst [vmem:[#allocation43_spill] sm:$0xff] %v2051_v43  ;;  %3770 = vst [vmem:[#allocation44_spill] sm:$0xff] %v2053_v51  ;;  %v662_v31 = vadd.f32 %v661_v49, %v2051_v43 }
 0x12d   :  { %v2056_v61 = vpop.f32.mrb[38].mxu0  ;;  %v2058_v37 = vpop.f32.mrb[38].mxu1 }
 0x12e   :  { %3771 = vst [vmem:[#allocation45_spill] sm:$0xff] %v2056_v61  ;;  %v609_v25 = vadd.f32 %v608_v2, %v2056_v61  ;;  %v2061_v60 = vpop.f32.mrb[39].mxu0  ;;  %v2063_v15 = vpop.f32.mrb[39].mxu1 }
 0x12f   :  { %3772 = vst [vmem:[#allocation46_spill] sm:$0xff] %v2061_v60  ;;  %3773 = vst [vmem:[#allocation47_spill] sm:$0xff] %v2063_v15  ;;  %v663_v13 = vadd.f32 %v662_v31, %v2061_v60 }
 0x131   :  { %v2066_v42 = vpop.f32.mrb[40].mxu0  ;;  %v2068_v19 = vpop.f32.mrb[40].mxu1 }
 0x132   :  { %3774 = vst [vmem:[#allocation48_spill] sm:$0xff] %v2066_v42  ;;  %v610_v7 = vadd.f32 %v609_v25, %v2066_v42  ;;  %v2071_v24 = vpop.f32.mrb[41].mxu0  ;;  %v2073_v49 = vpop.f32.mrb[41].mxu1 }
 0x133   :  { %3775 = vst [vmem:[#allocation49_spill] sm:$0xff] %v2071_v24  ;;  %3776 = vst [vmem:[#allocation50_spill] sm:$0xff] %v2073_v49  ;;  %v664_v43 = vadd.f32 %v663_v13, %v2071_v24 }
 0x135   :  { %v2076_v6 = vpop.f32.mrb[42].mxu0  ;;  %v2078_v2 = vpop.f32.mrb[42].mxu1 }
 0x136   :  { %3777 = vst [vmem:[#allocation51_spill] sm:$0xff] %v2076_v6  ;;  %v611_v61 = vadd.f32 %v610_v7, %v2076_v6  ;;  %v2081_v58 = vpop.f32.mrb[43].mxu0  ;;  %v2083_v31 = vpop.f32.mrb[43].mxu1 }
 0x137   :  { %3778 = vst [vmem:[#allocation52_spill] sm:$0xff] %v2081_v58  ;;  %3779 = vst [vmem:[#allocation53_spill] sm:$0xff] %v2083_v31  ;;  %v665_v60 = vadd.f32 %v664_v43, %v2081_v58 }
 0x139   :  { %v2086_v52 = vpop.f32.mrb[44].mxu0  ;;  %v2088_v25 = vpop.f32.mrb[44].mxu1 }
 0x13a   :  { %3780 = vst [vmem:[#allocation54_spill] sm:$0xff] %v2086_v52  ;;  %v612_v42 = vadd.f32 %v611_v61, %v2086_v52  ;;  %v2091_v46 = vpop.f32.mrb[45].mxu0  ;;  %v2093_v13 = vpop.f32.mrb[45].mxu1 }
 0x13b   :  { %3781 = vst [vmem:[#allocation55_spill] sm:$0xff] %v2091_v46  ;;  %3782 = vst [vmem:[#allocation56_spill] sm:$0xff] %v2093_v13  ;;  %v666_v24 = vadd.f32 %v665_v60, %v2091_v46 }
 0x13d   :  { %v2096_v40 = vpop.f32.mrb[46].mxu0  ;;  %v2098_v7 = vpop.f32.mrb[46].mxu1 }
 0x13e   :  { %3783 = vst [vmem:[#allocation57_spill] sm:$0xff] %v2096_v40  ;;  %v613_v6 = vadd.f32 %v612_v42, %v2096_v40  ;;  %v2101_v34 = vpop.f32.mrb[47].mxu0  ;;  %v2103_v43 = vpop.f32.mrb[47].mxu1 }
 0x13f   :  { %3784 = vst [vmem:[#allocation58_spill] sm:$0xff] %v2101_v34  ;;  %3785 = vst [vmem:[#allocation59_spill] sm:$0xff] %v2103_v43  ;;  %v667_v58 = vadd.f32 %v666_v24, %v2101_v34 }
 0x141   :  { %v2106_v28 = vpop.f32.mrb[48].mxu0 }
 0x142   :  { %3786 = vst [vmem:[#allocation60_spill] sm:$0xff] %v2106_v28  ;;  %v614_v61 = vadd.f32 %v613_v6, %v2106_v28  ;;  %v2109_v52 = vpop.f32.mrb[49].mxu0 }
 0x143   :  { %v668_v60 = vadd.f32 %v667_v58, %v2109_v52 }
 0x144   :  { %v615_v46 = vadd.f32 %v614_v61, %v1868_v1 }
 0x145   :  { %v669_v22 = vadd.f32 %v668_v60, %v1872_v3 }
 0x146   :  { %v616_v42 = vadd.f32 %v615_v46, %v1876_v5 }
 0x147   :  { %v670_v40 = vadd.f32 %v669_v22, %v1882_v8 }
 0x148   :  { %v617_v16 = vadd.f32 %v616_v42, %v1888_v11 }
 0x149   :  { %v671_v24 = vadd.f32 %v670_v40, %v1893_v14 }
 0x14a   :  { %v618_v34 = vadd.f32 %v617_v16, %v1898_v17 }
 0x14b   :  { %v672_v6 = vadd.f32 %v671_v24, %v1903_v20 }
 0x14c   :  { %v619_v28 = vadd.f32 %v618_v34, %v1908_v23 }
 0x14d   :  { %v673_v58 = vadd.f32 %v672_v6, %v1913_v26 }
 0x14e   :  { %v620_v61 = vadd.f32 %v619_v28, %v1918_v29 }
 0x14f   :  { %v674_v60 = vadd.f32 %v673_v58, %v1923_v32 }
 0x150   :  { %v621_v46 = vadd.f32 %v620_v61, %v1928_v35 }
 0x151   :  { %v675_v22 = vadd.f32 %v674_v60, %v1933_v38 }
 0x152   :  { %v622_v42 = vadd.f32 %v621_v46, %v1938_v41 }
 0x153   :  { %v676_v40 = vadd.f32 %v675_v22, %v1943_v44 }
 0x154   :  { %v623_v16 = vadd.f32 %v622_v42, %v1948_v47 }
 0x155   :  { %v677_v24 = vadd.f32 %v676_v40, %v1953_v50 }
 0x156   :  { %v624_v34 = vadd.f32 %v623_v16, %v1958_v53 }
 0x157   :  { %v678_v6 = vadd.f32 %v677_v24, %v1963_v56 }
 0x158   :  { %v625_v28 = vadd.f32 %v624_v34, %v1968_v59 }
 0x159   :  { %v679_v58 = vadd.f32 %v678_v6, %v1973_v62 }
 0x15a   :  { %v626_v61 = vadd.f32 %v625_v28, %v1978_v9 }
 0x15b   :  { %v680_v60 = vadd.f32 %v679_v58, %v1983_v18 }
 0x15c   :  { %v627_v46 = vadd.f32 %v626_v61, %v1988_v27 }
 0x15d   :  { %v681_v22 = vadd.f32 %v680_v60, %v1993_v36 }
 0x15e   :  { %v628_v42 = vadd.f32 %v627_v46, %v1998_v45 }
 0x15f   :  { %v682_v40 = vadd.f32 %v681_v22, %v2003_v54 }
 0x160   :  { %v629_v16 = vadd.f32 %v628_v42, %v2008_v63 }
 0x161   :  { %v683_v24 = vadd.f32 %v682_v40, %v2013_v21 }
 0x162   :  { %v630_v34 = vadd.f32 %v629_v16, %v2018_v30 }
 0x163   :  { %v684_v6 = vadd.f32 %v683_v24, %v2023_v39 }
 0x164   :  { %v631_v28 = vadd.f32 %v630_v34, %v2028_v48 }
 0x165   :  { %v685_v58 = vadd.f32 %v684_v6, %v2033_v57 }
 0x166   :  { %v632_v61 = vadd.f32 %v631_v28, %v2038_v12 }
 0x167   :  { %v686_v60 = vadd.f32 %v685_v58, %v2043_v33 }
 0x168   :  { %v633_v46 = vadd.f32 %v632_v61, %v2048_v55 }
 0x169   :  { %v687_v22 = vadd.f32 %v686_v60, %v2053_v51 }
 0x16a   :  { %v634_v42 = vadd.f32 %v633_v46, %v2058_v37 }
 0x16b   :  { %v688_v40 = vadd.f32 %v687_v22, %v2063_v15 }
 0x16c   :  { %v635_v16 = vadd.f32 %v634_v42, %v2068_v19 }
 0x16d   :  { %v689_v24 = vadd.f32 %v688_v40, %v2073_v49 }
 0x16e   :  { %v636_v34 = vadd.f32 %v635_v16, %v2078_v2 }
 0x16f   :  { %v690_v6 = vadd.f32 %v689_v24, %v2083_v31 }
 0x170   :  { %v637_v28 = vadd.f32 %v636_v34, %v2088_v25 }
 0x171   :  { %v691_v58 = vadd.f32 %v690_v6, %v2093_v13 }
 0x172   :  { %v638_v61 = vadd.f32 %v637_v28, %v2098_v7  ;;  %v3790_v28 = vld [vmem:[#allocation8_spill] sm:$0xff] }
 0x173   :  { %v692_v60 = vadd.f32 %v691_v58, %v2103_v43 }
 0x174   :  { %v639_v51 = vrot.slane %v638_v61, 4 }
 0x175   :  { %v693_v46 = vrot.slane %v692_v60, 4 }
 0x176   :  { %v640_v33 = vadd.f32 %v639_v51, %v638_v61  ;;  %v3792_v51 = vld [vmem:[#allocation10_spill] sm:$0xff] }
 0x177   :  { %v694_v15 = vadd.f32 %v693_v46, %v692_v60 }
 0x178   :  { %v641_v22 = vrot.slane %v640_v33, 2 }
 0x179   :  { %v695_v40 = vrot.slane %v694_v15, 2 }
 0x17a   :  { %v642_v42 = vadd.f32 %v641_v22, %v640_v33  ;;  %v3794_v33 = vld [vmem:[#allocation12_spill] sm:$0xff] }
 0x17b   :  { %v696_v39 = vadd.f32 %v695_v40, %v694_v15 }
 0x17c   :  { %v643_v57 = vrot.slane %v642_v42, 1 }
 0x17e   :  { %v644_v49 = vadd.f32 %v643_v57, %v642_v42  ;;  %v3796_v57 = vld [vmem:[#allocation14_spill] sm:$0xff] }
 0x17f   :  { %v3804_v42 = vld [vmem:[#allocation22_spill] sm:$0xff] }
 0x180   :  { %v700_v16 = vmul.f32 0.0025510204, %v644_v49 }
 0x182   :  { %v2161_v24 = vsub.f32 %v1866_v0, %v700_v16  ;;  %v2164_v34 = vsub.f32 %v1874_v4, %v700_v16  ;;  %v2167_v6 = vsub.f32 %v1886_v10, %v700_v16  ;;  %v2170_v58 = vsub.f32 %v3790_v28, %v700_v16  ;;  %v3798_v0 = vld [vmem:[#allocation16_spill] sm:$0xff]  ;;  %v3800_v4 = vld [vmem:[#allocation18_spill] sm:$0xff] }
 0x183   :  { %v2173_v61 = vsub.f32 %v3792_v51, %v700_v16  ;;  %v2176_v60 = vsub.f32 %v3794_v33, %v700_v16  ;;  %v2179_v15 = vsub.f32 %v3796_v57, %v700_v16  ;;  %v2182_v49 = vsub.f32 %v3798_v0, %v700_v16  ;;  %v3802_v10 = vld [vmem:[#allocation20_spill] sm:$0xff]  ;;  %v3808_v33 = vld [vmem:[#allocation26_spill] sm:$0xff] }
 0x184   :  { %3787 = vst [vmem:[#allocation61_spill] sm:$0xff] %v2161_v24  ;;  %3788 = vst [vmem:[#allocation62_spill] sm:$0xff] %v2164_v34  ;;  %v2185_v46 = vsub.f32 %v3800_v4, %v700_v16  ;;  %v2188_v22 = vsub.f32 %v3802_v10, %v700_v16  ;;  %v2191_v40 = vsub.f32 %v3804_v42, %v700_v16  ;;  %v3806_v28 = vld [vmem:[#allocation24_spill] sm:$0xff]  ;;  %v3812_v0 = vld [vmem:[#allocation30_spill] sm:$0xff] }
 0x185   :  { %3789 = vst [vmem:[#allocation63_spill] sm:$0xff] %v2167_v6  ;;  %3791 = vst [vmem:[#allocation8_spill] sm:$0xff] %v2170_v58  ;;  %v2194_v51 = vsub.f32 %v3806_v28, %v700_v16  ;;  %v2197_v43 = vsub.f32 %v3808_v33, %v700_v16  ;;  %v3810_v57 = vld [vmem:[#allocation28_spill] sm:$0xff]  ;;  %v2203_v31 = vsub.f32 %v3812_v0, %v700_v16  ;;  %v3814_v4 = vld [vmem:[#allocation33_spill] sm:$0xff] }
 0x186   :  { %3793 = vst [vmem:[#allocation10_spill] sm:$0xff] %v2173_v61  ;;  %3795 = vst [vmem:[#allocation12_spill] sm:$0xff] %v2176_v60  ;;  %v2200_v13 = vsub.f32 %v3810_v57, %v700_v16  ;;  %v2206_v21 = vsub.f32 %v3814_v4, %v700_v16  ;;  %v3816_v10 = vld [vmem:[#allocation36_spill] sm:$0xff]  ;;  %v3818_v42 = vld [vmem:[#allocation39_spill] sm:$0xff] }
 0x187   :  { %3797 = vst [vmem:[#allocation14_spill] sm:$0xff] %v2179_v15  ;;  %3799 = vst [vmem:[#allocation16_spill] sm:$0xff] %v2182_v49  ;;  %v3820_v28 = vld [vmem:[#allocation42_spill] sm:$0xff]  ;;  %v3821_v33 = vld [vmem:[#allocation45_spill] sm:$0xff] }
 0x188   :  { %3801 = vst [vmem:[#allocation18_spill] sm:$0xff] %v2185_v46  ;;  %3803 = vst [vmem:[#allocation20_spill] sm:$0xff] %v2188_v22  ;;  %v2209_v22 = vsub.f32 %v3816_v10, %v700_v16  ;;  %v3822_v57 = vld [vmem:[#allocation48_spill] sm:$0xff]  ;;  %v3823_v0 = vld [vmem:[#allocation51_spill] sm:$0xff] }
 0x189   :  { %3805 = vst [vmem:[#allocation22_spill] sm:$0xff] %v2191_v40  ;;  %3807 = vst [vmem:[#allocation24_spill] sm:$0xff] %v2194_v51  ;;  %v2212_v40 = vsub.f32 %v3818_v42, %v700_v16  ;;  %v2215_v51 = vsub.f32 %v3820_v28, %v700_v16  ;;  %v3824_v4 = vld [vmem:[#allocation54_spill] sm:$0xff]  ;;  %v3825_v10 = vld [vmem:[#allocation57_spill] sm:$0xff]  ;;  %v2236_v28 = vsub.f32 %v1868_v1, %v700_v16 }
 0x18a   :  { %3809 = vst [vmem:[#allocation26_spill] sm:$0xff] %v2197_v43  ;;  %3811 = vst [vmem:[#allocation28_spill] sm:$0xff] %v2200_v13  ;;  %v2218_v43 = vsub.f32 %v3821_v33, %v700_v16  ;;  %v2221_v13 = vsub.f32 %v3822_v57, %v700_v16  ;;  %v3826_v42 = vld [vmem:[#allocation60_spill] sm:$0xff]  ;;  %v2239_v33 = vsub.f32 %v1876_v5, %v700_v16 }
 0x18b   :  { %3813 = vst [vmem:[#allocation30_spill] sm:$0xff] %v2203_v31  ;;  %3815 = vst [vmem:[#allocation33_spill] sm:$0xff] %v2206_v21  ;;  %v2224_v31 = vsub.f32 %v3823_v0, %v700_v16  ;;  %v2227_v21 = vsub.f32 %v3824_v4, %v700_v16  ;;  %v2242_v57 = vsub.f32 %v1888_v11, %v700_v16 }
 0x18c   :  { %3817 = vst [vmem:[#allocation36_spill] sm:$0xff] %v2209_v22  ;;  %3819 = vst [vmem:[#allocation39_spill] sm:$0xff] %v2212_v40  ;;  %v2230_v22 = vsub.f32 %v3825_v10, %v700_v16  ;;  %v2233_v40 = vsub.f32 %v3826_v42, %v700_v16  ;;  %v2245_v0 = vsub.f32 %v1898_v17, %v700_v16 }
 0x18d   :  { %3827 = vst [vmem:[#allocation42_spill] sm:$0xff] %v2242_v57  ;;  %v2248_v4 = vsub.f32 %v1908_v23, %v700_v16  ;;  %v2251_v10 = vsub.f32 %v1918_v29, %v700_v16  ;;  %v2254_v42 = vsub.f32 %v1928_v35, %v700_v16  ;;  %v2257_v1 = vsub.f32 %v1938_v41, %v700_v16 }
 0x18e   :  { %3828 = vst [vmem:[#allocation45_spill] sm:$0xff] %v2245_v0  ;;  %v2260_v5 = vsub.f32 %v1948_v47, %v700_v16  ;;  %v2263_v11 = vsub.f32 %v1958_v53, %v700_v16  ;;  %v2266_v17 = vsub.f32 %v1968_v59, %v700_v16  ;;  %v2269_v23 = vsub.f32 %v1978_v9, %v700_v16 }
 0x18f   :  { %3829 = vst [vmem:[#allocation48_spill] sm:$0xff] %v2248_v4  ;;  %3830 = vst [vmem:[#allocation51_spill] sm:$0xff] %v2251_v10  ;;  %v2272_v29 = vsub.f32 %v1988_v27, %v700_v16  ;;  %v2275_v35 = vsub.f32 %v1998_v45, %v700_v16  ;;  %v2278_v41 = vsub.f32 %v2008_v63, %v700_v16 }
 0x190   :  { %3831 = vst [vmem:[#allocation54_spill] sm:$0xff] %v2254_v42  ;;  %3832 = vst [vmem:[#allocation57_spill] sm:$0xff] %v2257_v1  ;;  %v2281_v47 = vsub.f32 %v2018_v30, %v700_v16  ;;  %v2284_v53 = vsub.f32 %v2028_v48, %v700_v16  ;;  %v2287_v59 = vsub.f32 %v2038_v12, %v700_v16  ;;  %v697_v12 = vrot.slane %v696_v39, 1 }
 0x191   :  { %3833 = vst [vmem:[#allocation60_spill] sm:$0xff] %v2260_v5  ;;  %3834 = vst [vmem:[#allocation64_spill] sm:$0xff] %v2263_v11  ;;  %v2290_v9 = vsub.f32 %v2048_v55, %v700_v16  ;;  %v2293_v27 = vsub.f32 %v2058_v37, %v700_v16  ;;  %v2296_v45 = vsub.f32 %v2068_v19, %v700_v16 }
 0x192   :  { %3835 = vst [vmem:[#allocation65_spill] sm:$0xff] %v2266_v17  ;;  %3836 = vst [vmem:[#allocation66_spill] sm:$0xff] %v2269_v23  ;;  %v2299_v63 = vsub.f32 %v2078_v2, %v700_v16  ;;  %v2302_v30 = vsub.f32 %v2088_v25, %v700_v16  ;;  %v2305_v48 = vsub.f32 %v2098_v7, %v700_v16 }
 0x193   :  { %3837 = vst [vmem:[#allocation67_spill] sm:$0xff] %v2272_v29  ;;  %3838 = vst [vmem:[#allocation68_spill] sm:$0xff] %v2275_v35  ;;  %v800_v55 = vmul.f32 %v2161_v24, %v2161_v24  ;;  %v802_v37 = vmul.f32 %v2164_v34, %v2164_v34  ;;  %v804_v19 = vmul.f32 %v2167_v6, %v2167_v6  ;;  %v3849_v6 = vld [vmem:[#allocation5_spill] sm:$0xff] }
 0x194   :  { %3839 = vst [vmem:[#allocation69_spill] sm:$0xff] %v2278_v41  ;;  %3840 = vst [vmem:[#allocation70_spill] sm:$0xff] %v2281_v47  ;;  %v806_v2 = vmul.f32 %v2170_v58, %v2170_v58  ;;  %v808_v25 = vmul.f32 %v2173_v61, %v2173_v61  ;;  %v812_v7 = vmul.f32 %v2179_v15, %v2179_v15  ;;  %v3850_v58 = vld [vmem:[#allocation6_spill] sm:$0xff]  ;;  %v3852_v15 = vld [vmem:[#allocation9_spill] sm:$0xff] }
 0x195   :  { %3841 = vst [vmem:[#allocation71_spill] sm:$0xff] %v2284_v53  ;;  %3842 = vst [vmem:[#allocation72_spill] sm:$0xff] %v2287_v59  ;;  %v698_v59 = vadd.f32 %v697_v12, %v696_v39  ;;  %v810_v39 = vmul.f32 %v2176_v60, %v2176_v60  ;;  %v814_v16 = vmul.f32 %v2182_v49, %v2182_v49  ;;  %v3851_v60 = vld [vmem:[#allocation7_spill] sm:$0xff] }
 0x196   :  { %3843 = vst [vmem:[#allocation73_spill] sm:$0xff] %v2290_v9  ;;  %3844 = vst [vmem:[#allocation74_spill] sm:$0xff] %v2293_v27  ;;  %v898_v12 = vadd.f32 %v802_v37, %v800_v55  ;;  %v3853_v49 = vld [vmem:[#allocation11_spill] sm:$0xff] }
 0x197   :  { %3845 = vst [vmem:[#allocation75_spill] sm:$0xff] %v2296_v45  ;;  %3846 = vst [vmem:[#allocation76_spill] sm:$0xff] %v2299_v63  ;;  %v2311_v27 = vmul.f32 0.0025510204, %v698_v59  ;;  %v816_v59 = vmul.f32 %v2185_v46, %v2185_v46 }
 0x198   :  { %3847 = vst [vmem:[#allocation77_spill] sm:$0xff] %v2302_v30  ;;  %3848 = vst [vmem:[#allocation78_spill] sm:$0xff] %v2305_v48  ;;  %v899_v55 = vadd.f32 %v898_v12, %v804_v19  ;;  %v3859_v19 = vld [vmem:[#allocation23_spill] sm:$0xff] }
 0x199   :  { %v2329_v34 = vsub.f32 %v3849_v6, %v2311_v27  ;;  %v2333_v61 = vsub.f32 %v3850_v58, %v2311_v27  ;;  %v2337_v24 = vsub.f32 %v3851_v60, %v2311_v27  ;;  %v2341_v48 = vsub.f32 %v3852_v15, %v2311_v27  ;;  %v3854_v6 = vld [vmem:[#allocation13_spill] sm:$0xff]  ;;  %v3855_v58 = vld [vmem:[#allocation15_spill] sm:$0xff] }
 0x19a   :  { %v2345_v46 = vsub.f32 %v3853_v49, %v2311_v27  ;;  %v2349_v37 = vsub.f32 %v3854_v6, %v2311_v27  ;;  %v2353_v30 = vsub.f32 %v3855_v58, %v2311_v27  ;;  %v3856_v60 = vld [vmem:[#allocation17_spill] sm:$0xff]  ;;  %v3857_v15 = vld [vmem:[#allocation19_spill] sm:$0xff]  ;;  %v2369_v12 = vsub.f32 %v3859_v19, %v2311_v27  ;;  %v3864_v19 = vld [vmem:[#allocation34_spill] sm:$0xff] }
 0x19b   :  { %v2357_v63 = vsub.f32 %v3856_v60, %v2311_v27  ;;  %v2361_v45 = vsub.f32 %v3857_v15, %v2311_v27  ;;  %v3858_v49 = vld [vmem:[#allocation21_spill] sm:$0xff]  ;;  %v900_v53 = vadd.f32 %v899_v55, %v806_v2  ;;  %v3861_v60 = vld [vmem:[#allocation27_spill] sm:$0xff]  ;;  %v2389_v29 = vsub.f32 %v3864_v19, %v2311_v27  ;;  %v3866_v2 = vld [vmem:[#allocation40_spill] sm:$0xff] }
 0x19c   :  { %v2365_v9 = vsub.f32 %v3858_v49, %v2311_v27  ;;  %v3860_v6 = vld [vmem:[#allocation25_spill] sm:$0xff]  ;;  %v2377_v47 = vsub.f32 %v3861_v60, %v2311_v27  ;;  %v3863_v49 = vld [vmem:[#allocation31_spill] sm:$0xff]  ;;  %v2397_v55 = vsub.f32 %v3866_v2, %v2311_v27 }
 0x19d   :  { %v2373_v58 = vsub.f32 %v3860_v6, %v2311_v27  ;;  %v3862_v15 = vld [vmem:[#allocation29_spill] sm:$0xff]  ;;  %v2385_v35 = vsub.f32 %v3863_v49, %v2311_v27  ;;  %v3868_v60 = vld [vmem:[#allocation43_spill] sm:$0xff]  ;;  %v901_v17 = vadd.f32 %v900_v53, %v808_v25  ;;  %v3870_v49 = vld [vmem:[#allocation46_spill] sm:$0xff]  ;;  %v2425_v53 = vsub.f32 %v2109_v52, %v2311_v27 }
 0x19e   :  { %v2381_v41 = vsub.f32 %v3862_v15, %v2311_v27  ;;  %v3865_v6 = vld [vmem:[#allocation37_spill] sm:$0xff]  ;;  %3867 = vst [vmem:[#allocation5_spill] sm:$0xff] %v2397_v55  ;;  %v2401_v15 = vsub.f32 %v3868_v60, %v2311_v27  ;;  %v2405_v11 = vsub.f32 %v3870_v49, %v2311_v27  ;;  %v3873_v2 = vld [vmem:[#allocation55_spill] sm:$0xff]  ;;  %v3874_v60 = vld [vmem:[#allocation58_spill] sm:$0xff]  ;;  %v2429_v25 = vsub.f32 %v1872_v3, %v2311_v27 }
 0x19f   :  { %v2393_v23 = vsub.f32 %v3865_v6, %v2311_v27  ;;  %v3871_v19 = vld [vmem:[#allocation49_spill] sm:$0xff]  ;;  %v3872_v6 = vld [vmem:[#allocation52_spill] sm:$0xff]  ;;  %v2417_v55 = vsub.f32 %v3873_v2, %v2311_v27  ;;  %v902_v49 = vadd.f32 %v901_v17, %v810_v39  ;;  %v2441_v2 = vsub.f32 %v1903_v20, %v2311_v27 }
 0x1a0   :  { %3869 = vst [vmem:[#allocation6_spill] sm:$0xff] %v2401_v15  ;;  %v2409_v5 = vsub.f32 %v3871_v19, %v2311_v27  ;;  %v2413_v1 = vsub.f32 %v3872_v6, %v2311_v27  ;;  %v2421_v15 = vsub.f32 %v3874_v60, %v2311_v27  ;;  %v2433_v19 = vsub.f32 %v1882_v8, %v2311_v27  ;;  %v3884_v39 = vld [vmem:[#allocation32_spill] sm:$0xff] }
 0x1a1   :  { %v2437_v6 = vsub.f32 %v1893_v14, %v2311_v27  ;;  %v2445_v52 = vsub.f32 %v1913_v26, %v2311_v27  ;;  %v2449_v3 = vsub.f32 %v1923_v32, %v2311_v27  ;;  %v2453_v8 = vsub.f32 %v1933_v38, %v2311_v27 }
 0x1a2   :  { %v2457_v14 = vsub.f32 %v1943_v44, %v2311_v27  ;;  %v903_v17 = vadd.f32 %v902_v49, %v812_v7  ;;  %v2461_v20 = vsub.f32 %v1953_v50, %v2311_v27  ;;  %v2465_v26 = vsub.f32 %v1963_v56, %v2311_v27 }
 0x1a3   :  { %3875 = vst [vmem:[#allocation7_spill] sm:$0xff] %v2449_v3  ;;  %3876 = vst [vmem:[#allocation9_spill] sm:$0xff] %v2453_v8  ;;  %v2469_v32 = vsub.f32 %v1973_v62, %v2311_v27  ;;  %v2473_v38 = vsub.f32 %v1983_v18, %v2311_v27  ;;  %v2477_v44 = vsub.f32 %v1993_v36, %v2311_v27  ;;  %v3886_v62 = vld [vmem:[#allocation35_spill] sm:$0xff]  ;;  %v3888_v18 = vld [vmem:[#allocation38_spill] sm:$0xff] }
 0x1a4   :  { %3877 = vst [vmem:[#allocation11_spill] sm:$0xff] %v2457_v14  ;;  %3878 = vst [vmem:[#allocation13_spill] sm:$0xff] %v2461_v20  ;;  %v2481_v50 = vsub.f32 %v2003_v54, %v2311_v27  ;;  %v2485_v56 = vsub.f32 %v3884_v39, %v2311_v27  ;;  %v904_v7 = vadd.f32 %v903_v17, %v814_v16  ;;  %v3890_v36 = vld [vmem:[#allocation41_spill] sm:$0xff]  ;;  %v3892_v54 = vld [vmem:[#allocation44_spill] sm:$0xff] }
 0x1a5   :  { %3879 = vst [vmem:[#allocation15_spill] sm:$0xff] %v2465_v26  ;;  %3880 = vst [vmem:[#allocation17_spill] sm:$0xff] %v2469_v32  ;;  %v2489_v60 = vsub.f32 %v3886_v62, %v2311_v27  ;;  %v2493_v49 = vsub.f32 %v3888_v18, %v2311_v27  ;;  %v3894_v39 = vld [vmem:[#allocation47_spill] sm:$0xff]  ;;  %v3896_v16 = vld [vmem:[#allocation50_spill] sm:$0xff] }
 0x1a6   :  { %3881 = vst [vmem:[#allocation19_spill] sm:$0xff] %v2473_v38  ;;  %3882 = vst [vmem:[#allocation21_spill] sm:$0xff] %v2477_v44  ;;  %v2497_v44 = vsub.f32 %v3890_v36, %v2311_v27  ;;  %v2509_v17 = vsub.f32 %v3896_v16, %v2311_v27  ;;  %v3898_v62 = vld [vmem:[#allocation53_spill] sm:$0xff]  ;;  %v3905_v38 = vld [vmem:[#allocation24_spill] sm:$0xff] }
 0x1a7   :  { %3883 = vst [vmem:[#allocation23_spill] sm:$0xff] %v2481_v50  ;;  %3885 = vst [vmem:[#allocation25_spill] sm:$0xff] %v2485_v56  ;;  %v2501_v50 = vsub.f32 %v3892_v54, %v2311_v27  ;;  %v2505_v56 = vsub.f32 %v3894_v39, %v2311_v27  ;;  %v2513_v18 = vsub.f32 %v3898_v62, %v2311_v27  ;;  %v3906_v32 = vld [vmem:[#allocation26_spill] sm:$0xff] }
 0x1a8   :  { %3887 = vst [vmem:[#allocation27_spill] sm:$0xff] %v2489_v60  ;;  %3889 = vst [vmem:[#allocation29_spill] sm:$0xff] %v2493_v49  ;;  %v3900_v49 = vld [vmem:[#allocation20_spill] sm:$0xff]  ;;  %v822_v62 = vmul.f32 %v3905_v38, %v3905_v38  ;;  %v3908_v26 = vld [vmem:[#allocation30_spill] sm:$0xff] }
 0x1a9   :  { %3891 = vst [vmem:[#allocation31_spill] sm:$0xff] %v2497_v44  ;;  %3893 = vst [vmem:[#allocation34_spill] sm:$0xff] %v2501_v50  ;;  %v818_v36 = vmul.f32 %v3900_v49, %v3900_v49  ;;  %v905_v44 = vadd.f32 %v904_v7, %v816_v59  ;;  %v3901_v60 = vld [vmem:[#allocation56_spill] sm:$0xff]  ;;  %v3903_v50 = vld [vmem:[#allocation59_spill] sm:$0xff]  ;;  %v824_v49 = vmul.f32 %v3906_v32, %v3906_v32 }
 0x1aa   :  { %3895 = vst [vmem:[#allocation37_spill] sm:$0xff] %v2505_v56  ;;  %3897 = vst [vmem:[#allocation40_spill] sm:$0xff] %v2509_v17  ;;  %v2519_v54 = vsub.f32 %v3901_v60, %v2311_v27  ;;  %v2523_v39 = vsub.f32 %v3903_v50, %v2311_v27  ;;  %v3904_v56 = vld [vmem:[#allocation22_spill] sm:$0xff]  ;;  %v3907_v7 = vld [vmem:[#allocation28_spill] sm:$0xff]  ;;  %v828_v27 = vmul.f32 %v3908_v26, %v3908_v26 }
 0x1ab   :  { %3899 = vst [vmem:[#allocation43_spill] sm:$0xff] %v2513_v18  ;;  %v820_v16 = vmul.f32 %v3904_v56, %v3904_v56  ;;  %v906_v17 = vadd.f32 %v905_v44, %v818_v36  ;;  %v826_v60 = vmul.f32 %v3907_v7, %v3907_v7  ;;  %v801_v56 = vmul.f32 %v2329_v34, %v2329_v34  ;;  %v3909_v36 = vld [vmem:[#allocation33_spill] sm:$0xff]  ;;  %v3910_v32 = vld [vmem:[#allocation36_spill] sm:$0xff]  ;;  %v3911_v26 = vld [vmem:[#allocation39_spill] sm:$0xff] }
 0x1ac   :  { %3902 = vst [vmem:[#allocation46_spill] sm:$0xff] %v2519_v54  ;;  %v803_v44 = vmul.f32 %v2333_v61, %v2333_v61  ;;  %v807_v7 = vmul.f32 %v2341_v48, %v2341_v48 }
 0x1ad   :  { %v907_v18 = vadd.f32 %v906_v17, %v820_v16  ;;  %v830_v17 = vmul.f32 %v3909_v36, %v3909_v36  ;;  %v836_v36 = vmul.f32 %v2215_v51, %v2215_v51 }
 0x1af   :  { %v908_v59 = vadd.f32 %v907_v18, %v822_v62  ;;  %v832_v18 = vmul.f32 %v3910_v32, %v3910_v32 }
 0x1b1   :  { %v909_v54 = vadd.f32 %v908_v59, %v824_v49  ;;  %v805_v49 = vmul.f32 %v2337_v24, %v2337_v24  ;;  %v952_v59 = vadd.f32 %v803_v44, %v801_v56  ;;  %v811_v44 = vmul.f32 %v2349_v37, %v2349_v37 }
 0x1b3   :  { %v910_v50 = vadd.f32 %v909_v54, %v826_v60  ;;  %v834_v54 = vmul.f32 %v3911_v26, %v3911_v26  ;;  %v953_v38 = vadd.f32 %v952_v59, %v805_v49  ;;  %v813_v59 = vmul.f32 %v2353_v30, %v2353_v30 }
 0x1b5   :  { %v911_v16 = vadd.f32 %v910_v50, %v828_v27  ;;  %v809_v50 = vmul.f32 %v2345_v46, %v2345_v46 }
 0x1b7   :  { %v912_v62 = vadd.f32 %v911_v16, %v830_v17  ;;  %v954_v17 = vadd.f32 %v953_v38, %v807_v7  ;;  %v838_v16 = vmul.f32 %v2218_v43, %v2218_v43  ;;  %v815_v7 = vmul.f32 %v2357_v63, %v2357_v63 }
 0x1b9   :  { %v913_v60 = vadd.f32 %v912_v62, %v832_v18  ;;  %v955_v18 = vadd.f32 %v954_v17, %v809_v50  ;;  %v840_v62 = vmul.f32 %v2221_v13, %v2221_v13  ;;  %v817_v17 = vmul.f32 %v2361_v45, %v2361_v45 }
 0x1bb   :  { %v914_v27 = vadd.f32 %v913_v60, %v834_v54  ;;  %v956_v54 = vadd.f32 %v955_v18, %v811_v44  ;;  %v842_v60 = vmul.f32 %v2224_v31, %v2224_v31  ;;  %v819_v18 = vmul.f32 %v2365_v9, %v2365_v9 }
 0x1bd   :  { %v915_v56 = vadd.f32 %v914_v27, %v836_v36  ;;  %v957_v36 = vadd.f32 %v956_v54, %v813_v59  ;;  %v844_v27 = vmul.f32 %v2227_v21, %v2227_v21  ;;  %v821_v54 = vmul.f32 %v2369_v12, %v2369_v12 }
 0x1bf   :  { %v916_v49 = vadd.f32 %v915_v56, %v838_v16  ;;  %v958_v16 = vadd.f32 %v957_v36, %v815_v7  ;;  %v846_v56 = vmul.f32 %v2230_v22, %v2230_v22  ;;  %v823_v36 = vmul.f32 %v2373_v58, %v2373_v58 }
 0x1c1   :  { %v917_v38 = vadd.f32 %v916_v49, %v840_v62  ;;  %v959_v62 = vadd.f32 %v958_v16, %v817_v17  ;;  %v848_v49 = vmul.f32 %v2233_v40, %v2233_v40  ;;  %v825_v16 = vmul.f32 %v2377_v47, %v2377_v47 }
 0x1c3   :  { %v918_v50 = vadd.f32 %v917_v38, %v842_v60  ;;  %v960_v60 = vadd.f32 %v959_v62, %v819_v18  ;;  %v850_v38 = vmul.f32 %v2236_v28, %v2236_v28  ;;  %v827_v62 = vmul.f32 %v2381_v41, %v2381_v41 }
 0x1c5   :  { %v919_v44 = vadd.f32 %v918_v50, %v844_v27  ;;  %v961_v27 = vadd.f32 %v960_v60, %v821_v54  ;;  %v852_v50 = vmul.f32 %v2239_v33, %v2239_v33  ;;  %v829_v60 = vmul.f32 %v2385_v35, %v2385_v35 }
 0x1c7   :  { %v920_v59 = vadd.f32 %v919_v44, %v846_v56  ;;  %v962_v56 = vadd.f32 %v961_v27, %v823_v36  ;;  %v854_v44 = vmul.f32 %v2242_v57, %v2242_v57  ;;  %v831_v27 = vmul.f32 %v2389_v29, %v2389_v29 }
 0x1c9   :  { %v921_v7 = vadd.f32 %v920_v59, %v848_v49  ;;  %v963_v49 = vadd.f32 %v962_v56, %v825_v16  ;;  %v856_v59 = vmul.f32 %v2245_v0, %v2245_v0  ;;  %v833_v56 = vmul.f32 %v2393_v23, %v2393_v23 }
 0x1cb   :  { %v922_v17 = vadd.f32 %v921_v7, %v850_v38  ;;  %v964_v38 = vadd.f32 %v963_v49, %v827_v62  ;;  %v858_v7 = vmul.f32 %v2248_v4, %v2248_v4  ;;  %v3912_v49 = vld [vmem:[#allocation5_spill] sm:$0xff] }
 0x1cc   :  { %v835_v4 = vmul.f32 %v3912_v49, %v3912_v49 }
 0x1cd   :  { %v923_v18 = vadd.f32 %v922_v17, %v852_v50  ;;  %v965_v50 = vadd.f32 %v964_v38, %v829_v60  ;;  %v860_v17 = vmul.f32 %v2251_v10, %v2251_v10  ;;  %v3914_v38 = vld [vmem:[#allocation6_spill] sm:$0xff] }
 0x1ce   :  { %v837_v10 = vmul.f32 %v3914_v38, %v3914_v38 }
 0x1cf   :  { %v924_v54 = vadd.f32 %v923_v18, %v854_v44  ;;  %v966_v44 = vadd.f32 %v965_v50, %v831_v27  ;;  %v862_v18 = vmul.f32 %v2254_v42, %v2254_v42  ;;  %v839_v50 = vmul.f32 %v2405_v11, %v2405_v11 }
 0x1d1   :  { %v925_v36 = vadd.f32 %v924_v54, %v856_v59  ;;  %v967_v59 = vadd.f32 %v966_v44, %v833_v56  ;;  %v3913_v54 = vld [vmem:[#allocation57_spill] sm:$0xff]  ;;  %v841_v44 = vmul.f32 %v2409_v5, %v2409_v5 }
 0x1d2   :  { %v864_v0 = vmul.f32 %v3913_v54, %v3913_v54 }
 0x1d3   :  { %v926_v16 = vadd.f32 %v925_v36, %v858_v7  ;;  %v968_v7 = vadd.f32 %v967_v59, %v835_v4  ;;  %v3915_v36 = vld [vmem:[#allocation60_spill] sm:$0xff]  ;;  %v843_v59 = vmul.f32 %v2413_v1, %v2413_v1 }
 0x1d4   :  { %v866_v57 = vmul.f32 %v3915_v36, %v3915_v36 }
 0x1d5   :  { %v927_v62 = vadd.f32 %v926_v16, %v860_v17  ;;  %v969_v17 = vadd.f32 %v968_v7, %v837_v10  ;;  %v3916_v16 = vld [vmem:[#allocation64_spill] sm:$0xff]  ;;  %v845_v7 = vmul.f32 %v2417_v55, %v2417_v55 }
 0x1d6   :  { %v868_v42 = vmul.f32 %v3916_v16, %v3916_v16 }
 0x1d7   :  { %v928_v60 = vadd.f32 %v927_v62, %v862_v18  ;;  %v970_v18 = vadd.f32 %v969_v17, %v839_v50  ;;  %v3917_v62 = vld [vmem:[#allocation65_spill] sm:$0xff]  ;;  %v847_v17 = vmul.f32 %v2421_v15, %v2421_v15 }
 0x1d8   :  { %v870_v54 = vmul.f32 %v3917_v62, %v3917_v62 }
 0x1d9   :  { %v929_v27 = vadd.f32 %v928_v60, %v864_v0  ;;  %v971_v0 = vadd.f32 %v970_v18, %v841_v44  ;;  %v3918_v60 = vld [vmem:[#allocation66_spill] sm:$0xff]  ;;  %v849_v18 = vmul.f32 %v2425_v53, %v2425_v53 }
 0x1da   :  { %v872_v36 = vmul.f32 %v3918_v60, %v3918_v60 }
 0x1db   :  { %v930_v56 = vadd.f32 %v929_v27, %v866_v57  ;;  %v972_v57 = vadd.f32 %v971_v0, %v843_v59  ;;  %v3919_v27 = vld [vmem:[#allocation67_spill] sm:$0xff]  ;;  %v851_v0 = vmul.f32 %v2429_v25, %v2429_v25 }
 0x1dc   :  { %v874_v16 = vmul.f32 %v3919_v27, %v3919_v27 }
 0x1dd   :  { %v931_v4 = vadd.f32 %v930_v56, %v868_v42  ;;  %v973_v42 = vadd.f32 %v972_v57, %v845_v7  ;;  %v3920_v56 = vld [vmem:[#allocation68_spill] sm:$0xff]  ;;  %v853_v57 = vmul.f32 %v2433_v19, %v2433_v19 }
 0x1de   :  { %v876_v62 = vmul.f32 %v3920_v56, %v3920_v56 }
 0x1df   :  { %v932_v10 = vadd.f32 %v931_v4, %v870_v54  ;;  %v974_v54 = vadd.f32 %v973_v42, %v847_v17  ;;  %v3921_v4 = vld [vmem:[#allocation69_spill] sm:$0xff]  ;;  %v855_v42 = vmul.f32 %v2437_v6, %v2437_v6 }
 0x1e0   :  { %v878_v60 = vmul.f32 %v3921_v4, %v3921_v4 }
 0x1e1   :  { %v933_v50 = vadd.f32 %v932_v10, %v872_v36  ;;  %v975_v36 = vadd.f32 %v974_v54, %v849_v18  ;;  %v3922_v10 = vld [vmem:[#allocation70_spill] sm:$0xff]  ;;  %v857_v54 = vmul.f32 %v2441_v2, %v2441_v2 }
 0x1e2   :  { %v880_v27 = vmul.f32 %v3922_v10, %v3922_v10 }
 0x1e3   :  { %v934_v44 = vadd.f32 %v933_v50, %v874_v16  ;;  %v976_v16 = vadd.f32 %v975_v36, %v851_v0  ;;  %v3923_v50 = vld [vmem:[#allocation71_spill] sm:$0xff]  ;;  %v859_v36 = vmul.f32 %v2445_v52, %v2445_v52 }
 0x1e4   :  { %v882_v56 = vmul.f32 %v3923_v50, %v3923_v50 }
 0x1e5   :  { %v935_v59 = vadd.f32 %v934_v44, %v876_v62  ;;  %v977_v62 = vadd.f32 %v976_v16, %v853_v57  ;;  %v3924_v44 = vld [vmem:[#allocation72_spill] sm:$0xff]  ;;  %v861_v16 = vmul.f32 %v2449_v3, %v2449_v3 }
 0x1e6   :  { %v884_v4 = vmul.f32 %v3924_v44, %v3924_v44  ;;  %v3927_v44 = vld [vmem:[#allocation75_spill] sm:$0xff] }
 0x1e7   :  { %v936_v7 = vadd.f32 %v935_v59, %v878_v60  ;;  %v978_v60 = vadd.f32 %v977_v62, %v855_v42  ;;  %v3925_v59 = vld [vmem:[#allocation73_spill] sm:$0xff]  ;;  %v863_v42 = vmul.f32 %v2453_v8, %v2453_v8 }
 0x1e8   :  { %v886_v10 = vmul.f32 %v3925_v59, %v3925_v59  ;;  %v3931_v8 = vld [vmem:[#allocation77_spill] sm:$0xff] }
 0x1e9   :  { %v937_v17 = vadd.f32 %v936_v7, %v880_v27  ;;  %v979_v27 = vadd.f32 %v978_v60, %v857_v54  ;;  %v3926_v7 = vld [vmem:[#allocation74_spill] sm:$0xff] }
 0x1ea   :  { %v888_v50 = vmul.f32 %v3926_v7, %v3926_v7  ;;  %v3928_v7 = vld [vmem:[#allocation76_spill] sm:$0xff] }
 0x1eb   :  { %v938_v18 = vadd.f32 %v937_v17, %v882_v56  ;;  %v980_v56 = vadd.f32 %v979_v27, %v859_v36  ;;  %v892_v36 = vmul.f32 %v3928_v7, %v3928_v7 }
 0x1ed   :  { %v939_v0 = vadd.f32 %v938_v18, %v884_v4  ;;  %v981_v62 = vadd.f32 %v980_v56, %v861_v16  ;;  %v890_v4 = vmul.f32 %v3927_v44, %v3927_v44  ;;  %v865_v18 = vmul.f32 %v2457_v14, %v2457_v14  ;;  %v3930_v56 = vld [vmem:[#allocation17_spill] sm:$0xff]  ;;  %v3934_v14 = vld [vmem:[#allocation78_spill] sm:$0xff] }
 0x1ee   :  { %v871_v44 = vmul.f32 %v3930_v56, %v3930_v56 }
 0x1ef   :  { %v940_v57 = vadd.f32 %v939_v0, %v886_v10  ;;  %v982_v54 = vadd.f32 %v981_v62, %v863_v42  ;;  %v867_v10 = vmul.f32 %v2461_v20, %v2461_v20  ;;  %v894_v42 = vmul.f32 %v3931_v8, %v3931_v8 }
 0x1f1   :  { %v941_v17 = vadd.f32 %v940_v57, %v888_v50  ;;  %v983_v0 = vadd.f32 %v982_v54, %v865_v18  ;;  %v3929_v50 = vld [vmem:[#allocation15_spill] sm:$0xff]  ;;  %v3933_v54 = vld [vmem:[#allocation21_spill] sm:$0xff] }
 0x1f2   :  { %v869_v27 = vmul.f32 %v3929_v50, %v3929_v50  ;;  %v875_v7 = vmul.f32 %v3933_v54, %v3933_v54  ;;  %v3937_v50 = vld [vmem:[#allocation27_spill] sm:$0xff] }
 0x1f3   :  { %v942_v60 = vadd.f32 %v941_v17, %v890_v4  ;;  %v984_v57 = vadd.f32 %v983_v0, %v867_v10  ;;  %v3932_v17 = vld [vmem:[#allocation19_spill] sm:$0xff]  ;;  %v896_v10 = vmul.f32 %v3934_v14, %v3934_v14 }
 0x1f4   :  { %v873_v62 = vmul.f32 %v3932_v17, %v3932_v17  ;;  %v3939_v54 = vld [vmem:[#allocation31_spill] sm:$0xff] }
 0x1f5   :  { %v943_v16 = vadd.f32 %v942_v60, %v892_v36  ;;  %v985_v59 = vadd.f32 %v984_v57, %v869_v27  ;;  %v3935_v60 = vld [vmem:[#allocation23_spill] sm:$0xff]  ;;  %v3936_v57 = vld [vmem:[#allocation25_spill] sm:$0xff]  ;;  %v885_v14 = vmul.f32 %v3939_v54, %v3939_v54 }
 0x1f6   :  { %v877_v0 = vmul.f32 %v3935_v60, %v3935_v60  ;;  %v879_v8 = vmul.f32 %v3936_v57, %v3936_v57 }
 0x1f7   :  { %v986_v4 = vadd.f32 %v985_v59, %v871_v44  ;;  %v944_v18 = vadd.f32 %v943_v16, %v894_v42  ;;  %v881_v44 = vmul.f32 %v3937_v50, %v3937_v50  ;;  %v3938_v42 = vld [vmem:[#allocation29_spill] sm:$0xff] }
 0x1f9   :  { %v987_v20 = vadd.f32 %v986_v4, %v873_v62  ;;  %v945_v27 = vadd.f32 %v944_v18, %v896_v10  ;;  %v883_v62 = vmul.f32 %v3938_v42, %v3938_v42  ;;  %v3941_v10 = vld [vmem:[#allocation37_spill] sm:$0xff]  ;;  %v3943_v42 = vld [vmem:[#allocation43_spill] sm:$0xff] }
 0x1fb   :  { %v988_v36 = vadd.f32 %v987_v20, %v875_v7  ;;  %v946_v16 = vrot.slane %v945_v27, 4  ;;  %v3940_v20 = vld [vmem:[#allocation34_spill] sm:$0xff] }
 0x1fc   :  { %v887_v7 = vmul.f32 %v3940_v20, %v3940_v20 }
 0x1fd   :  { %v989_v56 = vadd.f32 %v988_v36, %v877_v0  ;;  %v947_v60 = vadd.f32 %v946_v16, %v945_v27  ;;  %v889_v0 = vmul.f32 %v3941_v10, %v3941_v10 }
 0x1ff   :  { %v990_v59 = vadd.f32 %v989_v56, %v879_v8  ;;  %v948_v50 = vrot.slane %v947_v60, 2  ;;  %v3942_v8 = vld [vmem:[#allocation40_spill] sm:$0xff] }
 0x200   :  { %v891_v56 = vmul.f32 %v3942_v8, %v3942_v8 }
 0x201   :  { %v991_v4 = vadd.f32 %v990_v59, %v881_v44  ;;  %v893_v44 = vmul.f32 %v3943_v42, %v3943_v42  ;;  %v949_v54 = vadd.f32 %v948_v50, %v947_v60 }
 0x203   :  { %v992_v17 = vadd.f32 %v991_v4, %v883_v62  ;;  %v3944_v62 = vld [vmem:[#allocation46_spill] sm:$0xff]  ;;  %v950_v4 = vrot.slane %v949_v54, 1 }
 0x204   :  { %v895_v27 = vmul.f32 %v3944_v62, %v3944_v62 }
 0x205   :  { %v993_v18 = vadd.f32 %v992_v17, %v885_v14  ;;  %v897_v14 = vmul.f32 %v2523_v39, %v2523_v39  ;;  %v951_v10 = vadd.f32 %v950_v4, %v949_v54 }
 0x207   :  { %v994_v36 = vadd.f32 %v993_v18, %v887_v7 }
 0x209   :  { %v995_v57 = vadd.f32 %v994_v36, %v889_v0  ;;  %v1006_v0 = vmul.f32 0.0025510204, %v951_v10 }
 0x20b   :  { %v996_v59 = vadd.f32 %v995_v57, %v891_v56  ;;  %v1009_v42 = vadd.f32 1e-05, %v1006_v0  ;;  %v1562_v56 = vmov 1966171168  }
 0x20d   :  { %v997_v16 = vadd.f32 %v996_v59, %v893_v44  ;;  %1533 = vrsqrt.f32 %v1009_v42  ;;  %v1017_v44 = vunpack.c.l.s4 %v1562_v56  ;;  %v1019_v59 = vlaneseq  ;;  %v1141_v42 = vld [vmem:[%s3613_s3] sm:$0x3] }
 0x20f   :  { %v998_v17 = vadd.f32 %v997_v16, %v895_v27  ;;  %v1018_v62 = vunpack.c.0.s8 %v1017_v44  ;;  %v1020_v27 = vshrl.u32 %v1019_v59, 7  ;;  %v3946_v44 = vld [vmem:[#allocation62_spill] sm:$0xff] }
 0x211   :  { %v999_v7 = vadd.f32 %v998_v17, %v897_v14  ;;  %v1021_v14 = vsub.s32 %v1018_v62, %v1020_v27 }
 0x213   :  { %v1000_v18 = vrot.slane %v999_v7, 4 }
 0x215   :  { %v1001_v20 = vadd.f32 %v1000_v18, %v999_v7 }
 0x217   :  { %v1002_v8 = vrot.slane %v1001_v20, 2  ;;  %v1534_v16 = vpop.eup %1533 }
 0x219   :  { %v1003_v36 = vadd.f32 %v1002_v8, %v1001_v20  ;;  %v1008_v20 = vld [vmem:[%s3612_s2] sm:$0x3]  ;;  %v1039_v8 = vsub.s32 1, %v1020_v27  ;;  %s1563_s2 = smov [#allocation2]  }
 0x21a   :  { %s1452_s3 = sshll.u32 %s1563_s2, 4  ;;  %s3589_s3 = int_to_ptr.vmem [resolvable:$true] %s1452_s3 }
 0x21b   :  { %v1004_v3 = vrot.slane %v1003_v36, 1  ;;  %v2711_v62 = vrot.slane %v1141_v42, %v1039_v8  ;;  %s1537_s28 = scalar_lea.vmem %s3589_s3, 12544  ;;  %p1542_p1 = scmp.lt.s32.totalorder %s3589_s3, %s3589_s3 }
 0x21c   :  { %p1538_p0 = scmp.ne.s32.totalorder %s3589_s3, %s1537_s28  ;;  %p1543_p2 = scmp.lt.s32.totalorder %s1537_s28, %s1537_s28 }
 0x21d   :  { %v1005_v57 = vadd.f32 %v1004_v3, %v1003_v36  ;;  %v1035_v3 = vsub.s32 0, %v1020_v27 }
 0x21e   :  { %p1544_p3 = por %p1543_p2, %p1542_p1 }
 0x21f   :  { %v1007_v50 = vmul.f32 0.0025510204, %v1005_v57  ;;  %v2713_v36 = vrot.slane %v1141_v42, %v1035_v3  ;;  %v3951_v42 = vld [vmem:[#allocation14_spill] sm:$0xff] }
 0x220   :  { %p1545_p4 = pnand %p1544_p3, %p1538_p0 }
 0x221   :  { %v1010_v60 = vadd.f32 1e-05, %v1007_v50  ;;  %v3945_v50 = vld [vmem:[#allocation61_spill] sm:$0xff] }
 0x223   :  { %1535 = vrsqrt.f32 %v1010_v60 }
 0x22d   :  { %v1536_v17 = vpop.eup %1535 }
 0x22e   :  { %v1015_v54 = vcombine.low %v1534_v16, %v1536_v17  ;;  %v3947_v16 = vld [vmem:[#allocation63_spill] sm:$0xff]  ;;  %v3948_v17 = vld [vmem:[#allocation8_spill] sm:$0xff] }
 0x230   :  { %v1022_v4 = vrot.slane %v1015_v54, %v1021_v14 }
 0x232   :  { %v1029_v10 = vrot.slane %v1022_v4, %v1021_v14 }
 0x234   :  { %v1031_v7 = vmul.f32 %v1029_v10, %v1008_v20 }
 0x236   :  { %v2707_v18 = vrot.slane %v1031_v7, %v1035_v3  ;;  %v2709_v0 = vrot.slane %v1031_v7, %v1039_v8 }
 0x238   :  { %v1140_v57 = vmul.f32 %v2709_v0, %v2523_v39  ;;  %v2719_v60 = vmul.f32 %v2707_v18, %v3945_v50  ;;  %v2723_v56 = vmul.f32 %v2709_v0, %v2329_v34  ;;  %v2727_v59 = vmul.f32 %v2707_v18, %v3946_v44  ;;  %v3952_v50 = vld [vmem:[#allocation16_spill] sm:$0xff] }
 0x239   :  { %v2731_v27 = vmul.f32 %v2709_v0, %v2333_v61  ;;  %v2735_v14 = vmul.f32 %v2707_v18, %v3947_v16  ;;  %v2739_v39 = vmul.f32 %v2709_v0, %v2337_v24  ;;  %v2743_v34 = vmul.f32 %v2707_v18, %v3948_v17  ;;  %v3949_v61 = vld [vmem:[#allocation10_spill] sm:$0xff]  ;;  %v3950_v24 = vld [vmem:[#allocation12_spill] sm:$0xff] }
 0x23a   :  { %v1250_v54 = vadd.f32 %v2711_v62, %v1140_v57  ;;  %v2748_v4 = vmul.f32 %v2709_v0, %v2341_v48  ;;  %v2752_v20 = vmul.f32 %v2707_v18, %v3949_v61  ;;  %v2756_v10 = vmul.f32 %v2709_v0, %v2345_v46  ;;  %v3953_v16 = vld [vmem:[#allocation18_spill] sm:$0xff]  ;;  %v3954_v61 = vld [vmem:[#allocation20_spill] sm:$0xff] }
 0x23b   :  { %v2760_v3 = vmul.f32 %v2707_v18, %v3950_v24  ;;  %v2764_v8 = vmul.f32 %v2709_v0, %v2349_v37  ;;  %v2768_v48 = vmul.f32 %v2707_v18, %v3951_v42  ;;  %v2772_v7 = vmul.f32 %v2709_v0, %v2353_v30  ;;  %v3955_v24 = vld [vmem:[#allocation22_spill] sm:$0xff] }
 0x23c   :  { %v1348_v57 = vmax.f32 %v1250_v54, 0.0  ;;  %v2776_v46 = vmul.f32 %v2707_v18, %v3952_v50  ;;  %v2780_v44 = vmul.f32 %v2709_v0, %v2357_v63  ;;  %v2784_v37 = vmul.f32 %v2707_v18, %v3953_v16  ;;  %v3956_v50 = vld [vmem:[#allocation24_spill] sm:$0xff] }
 0x23d   :  { %v2788_v17 = vmul.f32 %v2709_v0, %v2361_v45  ;;  %v2792_v30 = vmul.f32 %v2707_v18, %v3954_v61  ;;  %v2796_v54 = vmul.f32 %v2709_v0, %v2365_v9  ;;  %v2800_v63 = vmul.f32 %v2707_v18, %v3955_v24  ;;  %v3958_v61 = vld [vmem:[#allocation26_spill] sm:$0xff] }
 0x23e   :  { %1446 = vst [vmem:[#allocation2 + $0x308] sm:$0xff] %v1348_v57  ;;  %v2804_v42 = vmul.f32 %v2709_v0, %v2369_v12  ;;  %v2808_v45 = vmul.f32 %v2707_v18, %v3956_v50  ;;  %v2812_v16 = vmul.f32 %v2709_v0, %v2373_v58  ;;  %v2816_v9 = vmul.f32 %v2707_v18, %v3958_v61  ;;  %v3960_v57 = vld [vmem:[#allocation28_spill] sm:$0xff] }
 0x23f   :  { %v2820_v24 = vmul.f32 %v2709_v0, %v2377_v47  ;;  %v2824_v12 = vmul.f32 %v2707_v18, %v3960_v57  ;;  %v2828_v50 = vmul.f32 %v2709_v0, %v2381_v41  ;;  %v2836_v61 = vmul.f32 %v2709_v0, %v2385_v35 }
 0x240   :  { %3957 = vst [vmem:[#allocation49_spill] sm:$0xff] %v2808_v45  ;;  %3959 = vst [vmem:[#allocation52_spill] sm:$0xff] %v2816_v9  ;;  %v3961_v45 = vld [vmem:[#allocation30_spill] sm:$0xff]  ;;  %v3962_v9 = vld [vmem:[#allocation33_spill] sm:$0xff]  ;;  %v2844_v57 = vmul.f32 %v2709_v0, %v2389_v29  ;;  %v2848_v41 = vmul.f32 %v2707_v18, %v3910_v32  ;;  %v2856_v35 = vmul.f32 %v2707_v18, %v3911_v26 }
 0x241   :  { %v2832_v58 = vmul.f32 %v2707_v18, %v3961_v45  ;;  %v2840_v47 = vmul.f32 %v2707_v18, %v3962_v9  ;;  %v2852_v45 = vmul.f32 %v2709_v0, %v2393_v23  ;;  %v2860_v9 = vmul.f32 %v2709_v0, %v3912_v49 }
 0x242   :  { %v2864_v29 = vmul.f32 %v2707_v18, %v2215_v51  ;;  %v2868_v32 = vmul.f32 %v2709_v0, %v3914_v38  ;;  %v2872_v23 = vmul.f32 %v2707_v18, %v2218_v43  ;;  %v2876_v26 = vmul.f32 %v2709_v0, %v2405_v11 }
 0x243   :  { %v2880_v49 = vmul.f32 %v2707_v18, %v2221_v13  ;;  %v2884_v51 = vmul.f32 %v2709_v0, %v2409_v5  ;;  %v2888_v38 = vmul.f32 %v2707_v18, %v2224_v31  ;;  %v2892_v43 = vmul.f32 %v2709_v0, %v2413_v1 }
 0x244   :  { %v2896_v11 = vmul.f32 %v2707_v18, %v2227_v21  ;;  %v2900_v13 = vmul.f32 %v2709_v0, %v2417_v55  ;;  %v2904_v5 = vmul.f32 %v2707_v18, %v2230_v22  ;;  %v2908_v31 = vmul.f32 %v2709_v0, %v2421_v15 }
 0x245   :  { %v2912_v1 = vmul.f32 %v2707_v18, %v2233_v40  ;;  %v2916_v21 = vmul.f32 %v2709_v0, %v2425_v53  ;;  %v2920_v55 = vmul.f32 %v2707_v18, %v2236_v28  ;;  %v2924_v22 = vmul.f32 %v2709_v0, %v2429_v25 }
 0x246   :  { %v2928_v15 = vmul.f32 %v2707_v18, %v2239_v33  ;;  %v2932_v40 = vmul.f32 %v2709_v0, %v2433_v19  ;;  %v2940_v28 = vmul.f32 %v2709_v0, %v2437_v6  ;;  %v2948_v33 = vmul.f32 %v2709_v0, %v2441_v2 }
 0x247   :  { %3963 = vst [vmem:[#allocation55_spill] sm:$0xff] %v2912_v1  ;;  %3964 = vst [vmem:[#allocation58_spill] sm:$0xff] %v2920_v55  ;;  %v3966_v1 = vld [vmem:[#allocation42_spill] sm:$0xff]  ;;  %v3969_v55 = vld [vmem:[#allocation45_spill] sm:$0xff] }
 0x248   :  { %3965 = vst [vmem:[#allocation32_spill] sm:$0xff] %v2928_v15  ;;  %v2936_v53 = vmul.f32 %v2707_v18, %v3966_v1  ;;  %3968 = vst [vmem:[#allocation38_spill] sm:$0xff] %v2940_v28  ;;  %v2944_v25 = vmul.f32 %v2707_v18, %v3969_v55  ;;  %v3972_v15 = vld [vmem:[#allocation48_spill] sm:$0xff]  ;;  %v2956_v1 = vmul.f32 %v2709_v0, %v2445_v52  ;;  %v3977_v28 = vld [vmem:[#allocation7_spill] sm:$0xff] }
 0x249   :  { %3971 = vst [vmem:[#allocation44_spill] sm:$0xff] %v2948_v33  ;;  %v2952_v19 = vmul.f32 %v2707_v18, %v3972_v15  ;;  %v2964_v55 = vmul.f32 %v2709_v0, %v3977_v28  ;;  %v3981_v33 = vld [vmem:[#allocation9_spill] sm:$0xff] }
 0x24a   :  { %3967 = vst [vmem:[#allocation35_spill] sm:$0xff] %v2936_v53  ;;  %3970 = vst [vmem:[#allocation41_spill] sm:$0xff] %v2944_v25  ;;  %v3975_v53 = vld [vmem:[#allocation51_spill] sm:$0xff]  ;;  %v3979_v25 = vld [vmem:[#allocation54_spill] sm:$0xff]  ;;  %v2972_v15 = vmul.f32 %v2709_v0, %v3981_v33 }
 0x24b   :  { %3973 = vst [vmem:[#allocation47_spill] sm:$0xff] %v2952_v19  ;;  %3974 = vst [vmem:[#allocation50_spill] sm:$0xff] %v2956_v1  ;;  %v2960_v6 = vmul.f32 %v2707_v18, %v3975_v53  ;;  %v2968_v2 = vmul.f32 %v2707_v18, %v3979_v25  ;;  %v3983_v19 = vld [vmem:[#allocation57_spill] sm:$0xff]  ;;  %v3985_v1 = vld [vmem:[#allocation11_spill] sm:$0xff] }
 0x24c   :  { %3978 = vst [vmem:[#allocation56_spill] sm:$0xff] %v2964_v55  ;;  %3982 = vst [vmem:[#allocation36_spill] sm:$0xff] %v2972_v15  ;;  %v2976_v52 = vmul.f32 %v2707_v18, %v3983_v19  ;;  %v2980_v53 = vmul.f32 %v2709_v0, %v3985_v1  ;;  %v3989_v55 = vld [vmem:[#allocation13_spill] sm:$0xff]  ;;  %v3993_v15 = vld [vmem:[#allocation15_spill] sm:$0xff] }
 0x24d   :  { %3976 = vst [vmem:[#allocation53_spill] sm:$0xff] %v2960_v6  ;;  %3980 = vst [vmem:[#allocation59_spill] sm:$0xff] %v2968_v2  ;;  %v3987_v6 = vld [vmem:[#allocation60_spill] sm:$0xff]  ;;  %v2988_v25 = vmul.f32 %v2709_v0, %v3989_v55  ;;  %v2996_v19 = vmul.f32 %v2709_v0, %v3993_v15 }
 0x24e   :  { %3984 = vst [vmem:[#allocation39_spill] sm:$0xff] %v2976_v52  ;;  %3986 = vst [vmem:[#allocation5_spill] sm:$0xff] %v2980_v53  ;;  %v2984_v28 = vmul.f32 %v2707_v18, %v3987_v6  ;;  %v3991_v2 = vld [vmem:[#allocation64_spill] sm:$0xff]  ;;  %v3995_v52 = vld [vmem:[#allocation65_spill] sm:$0xff] }
 0x24f   :  { %3990 = vst [vmem:[#allocation61_spill] sm:$0xff] %v2988_v25  ;;  %v2992_v33 = vmul.f32 %v2707_v18, %v3991_v2  ;;  %3994 = vst [vmem:[#allocation63_spill] sm:$0xff] %v2996_v19  ;;  %v3000_v1 = vmul.f32 %v2707_v18, %v3995_v52  ;;  %v3997_v53 = vld [vmem:[#allocation17_spill] sm:$0xff]  ;;  %v4001_v25 = vld [vmem:[#allocation19_spill] sm:$0xff] }
 0x250   :  { %3988 = vst [vmem:[#allocation6_spill] sm:$0xff] %v2984_v28  ;;  %v3004_v6 = vmul.f32 %v2709_v0, %v3997_v53  ;;  %v3999_v28 = vld [vmem:[#allocation66_spill] sm:$0xff]  ;;  %v3012_v2 = vmul.f32 %v2709_v0, %v4001_v25  ;;  %v4005_v19 = vld [vmem:[#allocation21_spill] sm:$0xff] }
 0x251   :  { %3992 = vst [vmem:[#allocation62_spill] sm:$0xff] %v2992_v33  ;;  %3996 = vst [vmem:[#allocation8_spill] sm:$0xff] %v3000_v1  ;;  %v3008_v55 = vmul.f32 %v2707_v18, %v3999_v28  ;;  %v4003_v33 = vld [vmem:[#allocation67_spill] sm:$0xff]  ;;  %v3020_v52 = vmul.f32 %v2709_v0, %v4005_v19  ;;  %v4007_v1 = vld [vmem:[#allocation68_spill] sm:$0xff] }
 0x252   :  { %3998 = vst [vmem:[#allocation10_spill] sm:$0xff] %v3004_v6  ;;  %4002 = vst [vmem:[#allocation14_spill] sm:$0xff] %v3012_v2  ;;  %v3016_v15 = vmul.f32 %v2707_v18, %v4003_v33  ;;  %v3024_v53 = vmul.f32 %v2707_v18, %v4007_v1  ;;  %v4009_v6 = vld [vmem:[#allocation23_spill] sm:$0xff]  ;;  %v4013_v2 = vld [vmem:[#allocation25_spill] sm:$0xff] }
 0x253   :  { %4000 = vst [vmem:[#allocation12_spill] sm:$0xff] %v3008_v55  ;;  %4006 = vst [vmem:[#allocation18_spill] sm:$0xff] %v3020_v52  ;;  %v3028_v28 = vmul.f32 %v2709_v0, %v4009_v6  ;;  %v4011_v55 = vld [vmem:[#allocation69_spill] sm:$0xff]  ;;  %v3036_v33 = vmul.f32 %v2709_v0, %v4013_v2  ;;  %v4017_v52 = vld [vmem:[#allocation27_spill] sm:$0xff] }
 0x254   :  { %4004 = vst [vmem:[#allocation16_spill] sm:$0xff] %v3016_v15  ;;  %4008 = vst [vmem:[#allocation20_spill] sm:$0xff] %v3024_v53  ;;  %v3032_v25 = vmul.f32 %v2707_v18, %v4011_v55  ;;  %v4015_v15 = vld [vmem:[#allocation70_spill] sm:$0xff]  ;;  %v3044_v1 = vmul.f32 %v2709_v0, %v4017_v52  ;;  %v4019_v53 = vld [vmem:[#allocation71_spill] sm:$0xff] }
 0x255   :  { %4010 = vst [vmem:[#allocation22_spill] sm:$0xff] %v3028_v28  ;;  %4014 = vst [vmem:[#allocation26_spill] sm:$0xff] %v3036_v33  ;;  %v3040_v19 = vmul.f32 %v2707_v18, %v4015_v15  ;;  %v3048_v6 = vmul.f32 %v2707_v18, %v4019_v53  ;;  %v4021_v28 = vld [vmem:[#allocation29_spill] sm:$0xff]  ;;  %v4025_v33 = vld [vmem:[#allocation31_spill] sm:$0xff] }
 0x256   :  { %4012 = vst [vmem:[#allocation24_spill] sm:$0xff] %v3032_v25  ;;  %4018 = vst [vmem:[#allocation30_spill] sm:$0xff] %v3044_v1  ;;  %v3052_v55 = vmul.f32 %v2709_v0, %v4021_v28  ;;  %v4023_v25 = vld [vmem:[#allocation72_spill] sm:$0xff]  ;;  %v3060_v15 = vmul.f32 %v2709_v0, %v4025_v33  ;;  %v4029_v1 = vld [vmem:[#allocation34_spill] sm:$0xff] }
 0x257   :  { %4016 = vst [vmem:[#allocation28_spill] sm:$0xff] %v3040_v19  ;;  %4020 = vst [vmem:[#allocation33_spill] sm:$0xff] %v3048_v6  ;;  %v3056_v2 = vmul.f32 %v2707_v18, %v4023_v25  ;;  %v4027_v19 = vld [vmem:[#allocation73_spill] sm:$0xff]  ;;  %v3068_v53 = vmul.f32 %v2709_v0, %v4029_v1  ;;  %v4031_v6 = vld [vmem:[#allocation74_spill] sm:$0xff] }
 0x258   :  { %4022 = vst [vmem:[#allocation42_spill] sm:$0xff] %v3052_v55  ;;  %4026 = vst [vmem:[#allocation48_spill] sm:$0xff] %v3060_v15  ;;  %v3064_v52 = vmul.f32 %v2707_v18, %v4027_v19  ;;  %v3072_v28 = vmul.f32 %v2707_v18, %v4031_v6  ;;  %v4033_v55 = vld [vmem:[#allocation37_spill] sm:$0xff]  ;;  %v4037_v15 = vld [vmem:[#allocation40_spill] sm:$0xff] }
 0x259   :  { %4024 = vst [vmem:[#allocation45_spill] sm:$0xff] %v3056_v2  ;;  %4030 = vst [vmem:[#allocation7_spill] sm:$0xff] %v3068_v53  ;;  %v3076_v25 = vmul.f32 %v2709_v0, %v4033_v55  ;;  %v4035_v2 = vld [vmem:[#allocation75_spill] sm:$0xff]  ;;  %v3084_v19 = vmul.f32 %v2709_v0, %v4037_v15 }
 0x25a   :  { %4028 = vst [vmem:[#allocation51_spill] sm:$0xff] %v3064_v52  ;;  %4032 = vst [vmem:[#allocation54_spill] sm:$0xff] %v3072_v28  ;;  %v3080_v33 = vmul.f32 %v2707_v18, %v4035_v2  ;;  %v4038_v52 = vld [vmem:[#allocation76_spill] sm:$0xff]  ;;  %v4039_v53 = vld [vmem:[#allocation43_spill] sm:$0xff] }
 0x25b   :  { %4034 = vst [vmem:[#allocation9_spill] sm:$0xff] %v3076_v25  ;;  %v3088_v1 = vmul.f32 %v2707_v18, %v4038_v52  ;;  %v3092_v6 = vmul.f32 %v2709_v0, %v4039_v53  ;;  %v4040_v28 = vld [vmem:[#allocation77_spill] sm:$0xff]  ;;  %v4041_v25 = vld [vmem:[#allocation46_spill] sm:$0xff]  ;;  %v3108_v52 = vadd.f32 %v2713_v36, %v2719_v60  ;;  %v3112_v53 = vadd.f32 %v2711_v62, %v2723_v56 }
 0x25c   :  { %4036 = vst [vmem:[#allocation57_spill] sm:$0xff] %v3080_v33  ;;  %v3096_v55 = vmul.f32 %v2707_v18, %v4040_v28  ;;  %v3100_v2 = vmul.f32 %v2709_v0, %v4041_v25  ;;  %v4042_v33 = vld [vmem:[#allocation78_spill] sm:$0xff]  ;;  %v3116_v28 = vadd.f32 %v2713_v36, %v2727_v59  ;;  %v3120_v0 = vadd.f32 %v2711_v62, %v2731_v27  ;;  %v4043_v25 = vld [vmem:[#allocation49_spill] sm:$0xff] }
 0x25d   :  { %v3104_v15 = vmul.f32 %v2707_v18, %v4042_v33  ;;  %v3124_v18 = vadd.f32 %v2713_v36, %v2735_v14  ;;  %v3128_v60 = vadd.f32 %v2711_v62, %v2739_v39  ;;  %v3132_v56 = vadd.f32 %v2713_v36, %v2743_v34  ;;  %v4044_v33 = vld [vmem:[#allocation52_spill] sm:$0xff] }
 0x25e   :  { %v3136_v59 = vadd.f32 %v2711_v62, %v2748_v4  ;;  %v3140_v27 = vadd.f32 %v2713_v36, %v2752_v20  ;;  %v3144_v14 = vadd.f32 %v2711_v62, %v2756_v10  ;;  %v3148_v39 = vadd.f32 %v2713_v36, %v2760_v3 }
 0x25f   :  { %v3152_v34 = vadd.f32 %v2711_v62, %v2764_v8  ;;  %v3156_v4 = vadd.f32 %v2713_v36, %v2768_v48  ;;  %v3160_v20 = vadd.f32 %v2711_v62, %v2772_v7  ;;  %v3164_v10 = vadd.f32 %v2713_v36, %v2776_v46 }
 0x260   :  { %v3168_v3 = vadd.f32 %v2711_v62, %v2780_v44  ;;  %v3172_v8 = vadd.f32 %v2713_v36, %v2784_v37  ;;  %v3176_v48 = vadd.f32 %v2711_v62, %v2788_v17  ;;  %v3180_v7 = vadd.f32 %v2713_v36, %v2792_v30 }
 0x261   :  { %v3184_v46 = vadd.f32 %v2711_v62, %v2796_v54  ;;  %v3188_v44 = vadd.f32 %v2713_v36, %v2800_v63  ;;  %v3192_v37 = vadd.f32 %v2711_v62, %v2804_v42  ;;  %v3196_v17 = vadd.f32 %v2713_v36, %v4043_v25 }
 0x262   :  { %v3200_v30 = vadd.f32 %v2711_v62, %v2812_v16  ;;  %v3204_v54 = vadd.f32 %v2713_v36, %v4044_v33  ;;  %v3208_v63 = vadd.f32 %v2711_v62, %v2820_v24  ;;  %v3212_v42 = vadd.f32 %v2713_v36, %v2824_v12 }
 0x263   :  { %v3216_v25 = vadd.f32 %v2711_v62, %v2828_v50  ;;  %v3220_v16 = vadd.f32 %v2713_v36, %v2832_v58  ;;  %v3224_v33 = vadd.f32 %v2711_v62, %v2836_v61  ;;  %v3228_v24 = vadd.f32 %v2713_v36, %v2840_v47 }
 0x264   :  { %v3232_v12 = vadd.f32 %v2711_v62, %v2844_v57  ;;  %v3236_v50 = vadd.f32 %v2713_v36, %v2848_v41  ;;  %v3240_v58 = vadd.f32 %v2711_v62, %v2852_v45  ;;  %v3244_v61 = vadd.f32 %v2713_v36, %v2856_v35 }
 0x265   :  { %v3248_v47 = vadd.f32 %v2711_v62, %v2860_v9  ;;  %v3252_v57 = vadd.f32 %v2713_v36, %v2864_v29  ;;  %v3256_v41 = vadd.f32 %v2711_v62, %v2868_v32  ;;  %v3260_v45 = vadd.f32 %v2713_v36, %v2872_v23 }
 0x266   :  { %v3264_v35 = vadd.f32 %v2711_v62, %v2876_v26  ;;  %v3268_v9 = vadd.f32 %v2713_v36, %v2880_v49  ;;  %v3272_v29 = vadd.f32 %v2711_v62, %v2884_v51  ;;  %v3276_v32 = vadd.f32 %v2713_v36, %v2888_v38 }
 0x267   :  { %v3280_v23 = vadd.f32 %v2711_v62, %v2892_v43  ;;  %v3284_v26 = vadd.f32 %v2713_v36, %v2896_v11  ;;  %v3288_v49 = vadd.f32 %v2711_v62, %v2900_v13  ;;  %v3292_v51 = vadd.f32 %v2713_v36, %v2904_v5 }
 0x268   :  { %4045 = vst [vmem:[#allocation11_spill] sm:$0xff] %v3276_v32  ;;  %v3296_v38 = vadd.f32 %v2711_v62, %v2908_v31  ;;  %v4048_v32 = vld [vmem:[#allocation55_spill] sm:$0xff]  ;;  %v3304_v11 = vadd.f32 %v2711_v62, %v2916_v21  ;;  %v3312_v5 = vadd.f32 %v2711_v62, %v2924_v22 }
 0x269   :  { %4046 = vst [vmem:[#allocation60_spill] sm:$0xff] %v3284_v26  ;;  %4047 = vst [vmem:[#allocation13_spill] sm:$0xff] %v3292_v51  ;;  %v3300_v43 = vadd.f32 %v2713_v36, %v4048_v32  ;;  %v4051_v26 = vld [vmem:[#allocation58_spill] sm:$0xff]  ;;  %v4054_v51 = vld [vmem:[#allocation32_spill] sm:$0xff]  ;;  %v3320_v32 = vadd.f32 %v2711_v62, %v2932_v40 }
 0x26a   :  { %4050 = vst [vmem:[#allocation15_spill] sm:$0xff] %v3304_v11  ;;  %v3308_v13 = vadd.f32 %v2713_v36, %v4051_v26  ;;  %4053 = vst [vmem:[#allocation17_spill] sm:$0xff] %v3312_v5  ;;  %v3316_v31 = vadd.f32 %v2713_v36, %v4054_v51  ;;  %v4059_v11 = vld [vmem:[#allocation38_spill] sm:$0xff]  ;;  %v4063_v5 = vld [vmem:[#allocation44_spill] sm:$0xff] }
 0x26b   :  { %4049 = vst [vmem:[#allocation64_spill] sm:$0xff] %v3300_v43  ;;  %4056 = vst [vmem:[#allocation19_spill] sm:$0xff] %v3320_v32  ;;  %v4057_v43 = vld [vmem:[#allocation35_spill] sm:$0xff]  ;;  %v3328_v26 = vadd.f32 %v2711_v62, %v4059_v11  ;;  %v3336_v51 = vadd.f32 %v2711_v62, %v4063_v5  ;;  %v4067_v32 = vld [vmem:[#allocation50_spill] sm:$0xff] }
 0x26c   :  { %4052 = vst [vmem:[#allocation65_spill] sm:$0xff] %v3308_v13  ;;  %4055 = vst [vmem:[#allocation66_spill] sm:$0xff] %v3316_v31  ;;  %v3324_v21 = vadd.f32 %v2713_v36, %v4057_v43  ;;  %v4061_v13 = vld [vmem:[#allocation41_spill] sm:$0xff]  ;;  %v4065_v31 = vld [vmem:[#allocation47_spill] sm:$0xff]  ;;  %v3344_v43 = vadd.f32 %v2711_v62, %v4067_v32 }
 0x26d   :  { %4060 = vst [vmem:[#allocation21_spill] sm:$0xff] %v3328_v26  ;;  %v3332_v22 = vadd.f32 %v2713_v36, %v4061_v13  ;;  %4064 = vst [vmem:[#allocation23_spill] sm:$0xff] %v3336_v51  ;;  %v3340_v40 = vadd.f32 %v2713_v36, %v4065_v31  ;;  %v4071_v26 = vld [vmem:[#allocation56_spill] sm:$0xff] }
 0x26e   :  { %4058 = vst [vmem:[#allocation67_spill] sm:$0xff] %v3324_v21  ;;  %4068 = vst [vmem:[#allocation25_spill] sm:$0xff] %v3344_v43  ;;  %v4069_v21 = vld [vmem:[#allocation53_spill] sm:$0xff]  ;;  %v3352_v13 = vadd.f32 %v2711_v62, %v4071_v26  ;;  %v4075_v51 = vld [vmem:[#allocation36_spill] sm:$0xff] }
 0x26f   :  { %4062 = vst [vmem:[#allocation68_spill] sm:$0xff] %v3332_v22  ;;  %4066 = vst [vmem:[#allocation69_spill] sm:$0xff] %v3340_v40  ;;  %v3348_v11 = vadd.f32 %v2713_v36, %v4069_v21  ;;  %v4073_v22 = vld [vmem:[#allocation59_spill] sm:$0xff]  ;;  %v3360_v31 = vadd.f32 %v2711_v62, %v4075_v51  ;;  %v4079_v43 = vld [vmem:[#allocation5_spill] sm:$0xff] }
 0x270   :  { %4072 = vst [vmem:[#allocation27_spill] sm:$0xff] %v3352_v13  ;;  %v3356_v5 = vadd.f32 %v2713_v36, %v4073_v22  ;;  %v4077_v40 = vld [vmem:[#allocation39_spill] sm:$0xff]  ;;  %v3368_v21 = vadd.f32 %v2711_v62, %v4079_v43  ;;  %v4083_v13 = vld [vmem:[#allocation61_spill] sm:$0xff] }
 0x271   :  { %4070 = vst [vmem:[#allocation70_spill] sm:$0xff] %v3348_v11  ;;  %4076 = vst [vmem:[#allocation29_spill] sm:$0xff] %v3360_v31  ;;  %v3364_v32 = vadd.f32 %v2713_v36, %v4077_v40  ;;  %v4081_v11 = vld [vmem:[#allocation6_spill] sm:$0xff]  ;;  %v3376_v22 = vadd.f32 %v2711_v62, %v4083_v13  ;;  %v4087_v31 = vld [vmem:[#allocation63_spill] sm:$0xff] }
 0x272   :  { %4074 = vst [vmem:[#allocation71_spill] sm:$0xff] %v3356_v5  ;;  %4080 = vst [vmem:[#allocation31_spill] sm:$0xff] %v3368_v21  ;;  %v3372_v26 = vadd.f32 %v2713_v36, %v4081_v11  ;;  %v4085_v5 = vld [vmem:[#allocation62_spill] sm:$0xff]  ;;  %v3384_v40 = vadd.f32 %v2711_v62, %v4087_v31 }
 0x273   :  { %4078 = vst [vmem:[#allocation72_spill] sm:$0xff] %v3364_v32  ;;  %4084 = vst [vmem:[#allocation34_spill] sm:$0xff] %v3376_v22  ;;  %v3380_v51 = vadd.f32 %v2713_v36, %v4085_v5  ;;  %v4089_v32 = vld [vmem:[#allocation8_spill] sm:$0xff]  ;;  %v4091_v21 = vld [vmem:[#allocation10_spill] sm:$0xff] }
 0x274   :  { %4082 = vst [vmem:[#allocation73_spill] sm:$0xff] %v3372_v26  ;;  %4088 = vst [vmem:[#allocation37_spill] sm:$0xff] %v3384_v40  ;;  %v3388_v43 = vadd.f32 %v2713_v36, %v4089_v32  ;;  %v3392_v11 = vadd.f32 %v2711_v62, %v4091_v21  ;;  %v4093_v26 = vld [vmem:[#allocation12_spill] sm:$0xff]  ;;  %v4095_v22 = vld [vmem:[#allocation14_spill] sm:$0xff] }
 0x275   :  { %4086 = vst [vmem:[#allocation74_spill] sm:$0xff] %v3380_v51  ;;  %v3396_v13 = vadd.f32 %v2713_v36, %v4093_v26  ;;  %v3400_v5 = vadd.f32 %v2711_v62, %v4095_v22  ;;  %v4097_v51 = vld [vmem:[#allocation16_spill] sm:$0xff]  ;;  %v4099_v40 = vld [vmem:[#allocation18_spill] sm:$0xff] }
 0x276   :  { %4090 = vst [vmem:[#allocation75_spill] sm:$0xff] %v3388_v43  ;;  %4092 = vst [vmem:[#allocation40_spill] sm:$0xff] %v3392_v11  ;;  %v3404_v31 = vadd.f32 %v2713_v36, %v4097_v51  ;;  %v3408_v32 = vadd.f32 %v2711_v62, %v4099_v40  ;;  %v4101_v43 = vld [vmem:[#allocation20_spill] sm:$0xff]  ;;  %v4103_v11 = vld [vmem:[#allocation22_spill] sm:$0xff] }
 0x277   :  { %4094 = vst [vmem:[#allocation76_spill] sm:$0xff] %v3396_v13  ;;  %4096 = vst [vmem:[#allocation43_spill] sm:$0xff] %v3400_v5  ;;  %v3412_v21 = vadd.f32 %v2713_v36, %v4101_v43  ;;  %v3416_v26 = vadd.f32 %v2711_v62, %v4103_v11  ;;  %v4105_v13 = vld [vmem:[#allocation24_spill] sm:$0xff]  ;;  %v4107_v5 = vld [vmem:[#allocation26_spill] sm:$0xff] }
 0x278   :  { %4098 = vst [vmem:[#allocation77_spill] sm:$0xff] %v3404_v31  ;;  %4100 = vst [vmem:[#allocation46_spill] sm:$0xff] %v3408_v32  ;;  %v3420_v22 = vadd.f32 %v2713_v36, %v4105_v13  ;;  %v3424_v51 = vadd.f32 %v2711_v62, %v4107_v5  ;;  %v4109_v31 = vld [vmem:[#allocation28_spill] sm:$0xff]  ;;  %v4111_v32 = vld [vmem:[#allocation30_spill] sm:$0xff] }
 0x279   :  { %4102 = vst [vmem:[#allocation78_spill] sm:$0xff] %v3412_v21  ;;  %4104 = vst [vmem:[#allocation49_spill] sm:$0xff] %v3416_v26  ;;  %v3428_v40 = vadd.f32 %v2713_v36, %v4109_v31  ;;  %v3432_v43 = vadd.f32 %v2711_v62, %v4111_v32  ;;  %v4113_v21 = vld [vmem:[#allocation33_spill] sm:$0xff]  ;;  %v4115_v26 = vld [vmem:[#allocation42_spill] sm:$0xff] }
 0x27a   :  { %4106 = vst [vmem:[#allocation52_spill] sm:$0xff] %v3420_v22  ;;  %4108 = vst [vmem:[#allocation55_spill] sm:$0xff] %v3424_v51  ;;  %v3436_v11 = vadd.f32 %v2713_v36, %v4113_v21  ;;  %v3440_v13 = vadd.f32 %v2711_v62, %v4115_v26  ;;  %v4117_v22 = vld [vmem:[#allocation45_spill] sm:$0xff]  ;;  %v4119_v51 = vld [vmem:[#allocation48_spill] sm:$0xff] }
 0x27b   :  { %4110 = vst [vmem:[#allocation58_spill] sm:$0xff] %v3428_v40  ;;  %4112 = vst [vmem:[#allocation32_spill] sm:$0xff] %v3432_v43  ;;  %v3444_v5 = vadd.f32 %v2713_v36, %v4117_v22  ;;  %v3448_v31 = vadd.f32 %v2711_v62, %v4119_v51  ;;  %v4120_v40 = vld [vmem:[#allocation51_spill] sm:$0xff] }
 0x27c   :  { %4114 = vst [vmem:[#allocation35_spill] sm:$0xff] %v3436_v11  ;;  %4116 = vst [vmem:[#allocation38_spill] sm:$0xff] %v3440_v13  ;;  %v3452_v32 = vadd.f32 %v2713_v36, %v4120_v40  ;;  %v4121_v43 = vld [vmem:[#allocation7_spill] sm:$0xff]  ;;  %v4122_v11 = vld [vmem:[#allocation54_spill] sm:$0xff]  ;;  %v3472_v40 = vadd.f32 %v2711_v62, %v3084_v19  ;;  %v3492_v19 = vadd.f32 %v2713_v36, %v3104_v15  ;;  %v1261_v15 = vmax.f32 %v3148_v39, 0.0 }
 0x27d   :  { %4118 = vst [vmem:[#allocation41_spill] sm:$0xff] %v3444_v5  ;;  %v3456_v21 = vadd.f32 %v2711_v62, %v4121_v43  ;;  %v3460_v26 = vadd.f32 %v2713_v36, %v4122_v11  ;;  %v4123_v13 = vld [vmem:[#allocation9_spill] sm:$0xff]  ;;  %v3476_v43 = vadd.f32 %v2713_v36, %v3088_v1  ;;  %v3480_v11 = vadd.f32 %v2711_v62, %v3092_v6 }
 0x27e   :  { %v3464_v22 = vadd.f32 %v2711_v62, %v4123_v13  ;;  %v4124_v5 = vld [vmem:[#allocation57_spill] sm:$0xff]  ;;  %4125 = vst [vmem:[#allocation44_spill] sm:$0xff] %v3472_v40  ;;  %v3484_v13 = vadd.f32 %v2713_v36, %v3096_v55  ;;  %v1251_v40 = vmax.f32 %v3108_v52, 0.0  ;;  %v1252_v1 = vmax.f32 %v3112_v53, 0.0  ;;  %1359 = vst [vmem:[#allocation2 + $0x50] sm:$0xff] %v1261_v15 }
 0x27f   :  { %v3468_v51 = vadd.f32 %v2713_v36, %v4124_v5  ;;  %4126 = vst [vmem:[#allocation47_spill] sm:$0xff] %v3476_v43  ;;  %4127 = vst [vmem:[#allocation50_spill] sm:$0xff] %v3480_v11  ;;  %v3488_v5 = vadd.f32 %v2711_v62, %v3100_v2  ;;  %v1253_v43 = vmax.f32 %v3116_v28, 0.0  ;;  %v1254_v6 = vmax.f32 %v3120_v0, 0.0 }
 0x280   :  { %4128 = vst [vmem:[#allocation53_spill] sm:$0xff] %v3484_v13  ;;  %v1255_v11 = vmax.f32 %v3124_v18, 0.0  ;;  %v1256_v55 = vmax.f32 %v3128_v60, 0.0  ;;  %v1257_v13 = vmax.f32 %v3132_v56, 0.0  ;;  %v1258_v62 = vmax.f32 %v3136_v59, 0.0  ;;  %1349 = vst [vmem:[#allocation2] sm:$0xff] %v1251_v40 }
 0x281   :  { %v1259_v2 = vmax.f32 %v3140_v27, 0.0  ;;  %v1260_v36 = vmax.f32 %v3144_v14, 0.0  ;;  %1350 = vst [vmem:[#allocation2 + $0x8] sm:$0xff] %v1252_v1  ;;  %1351 = vst [vmem:[#allocation2 + $0x10] sm:$0xff] %v1253_v43  ;;  %v1262_v52 = vmax.f32 %v3152_v34, 0.0  ;;  %v1263_v53 = vmax.f32 %v3156_v4, 0.0 }
 0x282   :  { %v1264_v28 = vmax.f32 %v3160_v20, 0.0  ;;  %v1265_v0 = vmax.f32 %v3164_v10, 0.0  ;;  %1352 = vst [vmem:[#allocation2 + $0x18] sm:$0xff] %v1254_v6  ;;  %1353 = vst [vmem:[#allocation2 + $0x20] sm:$0xff] %v1255_v11  ;;  %v1266_v18 = vmax.f32 %v3168_v3, 0.0  ;;  %v1267_v60 = vmax.f32 %v3172_v8, 0.0 }
 0x283   :  { %1354 = vst [vmem:[#allocation2 + $0x28] sm:$0xff] %v1256_v55  ;;  %1355 = vst [vmem:[#allocation2 + $0x30] sm:$0xff] %v1257_v13  ;;  %v1268_v56 = vmax.f32 %v3176_v48, 0.0  ;;  %v1269_v59 = vmax.f32 %v3180_v7, 0.0  ;;  %v1270_v27 = vmax.f32 %v3184_v46, 0.0  ;;  %v1271_v14 = vmax.f32 %v3188_v44, 0.0 }
 0x284   :  { %1356 = vst [vmem:[#allocation2 + $0x38] sm:$0xff] %v1258_v62  ;;  %1357 = vst [vmem:[#allocation2 + $0x40] sm:$0xff] %v1259_v2  ;;  %v1272_v39 = vmax.f32 %v3192_v37, 0.0  ;;  %v1273_v34 = vmax.f32 %v3196_v17, 0.0  ;;  %v1274_v4 = vmax.f32 %v3200_v30, 0.0  ;;  %v1275_v20 = vmax.f32 %v3204_v54, 0.0 }
 0x285   :  { %1358 = vst [vmem:[#allocation2 + $0x48] sm:$0xff] %v1260_v36  ;;  %1360 = vst [vmem:[#allocation2 + $0x58] sm:$0xff] %v1262_v52  ;;  %v1276_v10 = vmax.f32 %v3208_v63, 0.0  ;;  %v1277_v3 = vmax.f32 %v3212_v42, 0.0  ;;  %v1278_v8 = vmax.f32 %v3216_v25, 0.0  ;;  %v1279_v48 = vmax.f32 %v3220_v16, 0.0 }
 0x286   :  { %1361 = vst [vmem:[#allocation2 + $0x60] sm:$0xff] %v1263_v53  ;;  %1362 = vst [vmem:[#allocation2 + $0x68] sm:$0xff] %v1264_v28  ;;  %v1280_v7 = vmax.f32 %v3224_v33, 0.0  ;;  %v1281_v46 = vmax.f32 %v3228_v24, 0.0  ;;  %v1282_v44 = vmax.f32 %v3232_v12, 0.0  ;;  %v1283_v37 = vmax.f32 %v3236_v50, 0.0 }
 0x287   :  { %1363 = vst [vmem:[#allocation2 + $0x70] sm:$0xff] %v1265_v0  ;;  %1364 = vst [vmem:[#allocation2 + $0x78] sm:$0xff] %v1266_v18  ;;  %v1284_v17 = vmax.f32 %v3240_v58, 0.0  ;;  %v1285_v30 = vmax.f32 %v3244_v61, 0.0  ;;  %v1286_v54 = vmax.f32 %v3248_v47, 0.0  ;;  %v1287_v63 = vmax.f32 %v3252_v57, 0.0 }
 0x288   :  { %1365 = vst [vmem:[#allocation2 + $0x80] sm:$0xff] %v1267_v60  ;;  %1366 = vst [vmem:[#allocation2 + $0x88] sm:$0xff] %v1268_v56  ;;  %v1288_v42 = vmax.f32 %v3256_v41, 0.0  ;;  %v1289_v25 = vmax.f32 %v3260_v45, 0.0  ;;  %v1290_v16 = vmax.f32 %v3264_v35, 0.0  ;;  %v1291_v33 = vmax.f32 %v3268_v9, 0.0 }
 0x289   :  { %1367 = vst [vmem:[#allocation2 + $0x90] sm:$0xff] %v1269_v59  ;;  %1368 = vst [vmem:[#allocation2 + $0x98] sm:$0xff] %v1270_v27  ;;  %v1292_v24 = vmax.f32 %v3272_v29, 0.0  ;;  %v4129_v12 = vld [vmem:[#allocation11_spill] sm:$0xff]  ;;  %v1294_v58 = vmax.f32 %v3280_v23, 0.0  ;;  %v4130_v61 = vld [vmem:[#allocation60_spill] sm:$0xff] }
 0x28a   :  { %1369 = vst [vmem:[#allocation2 + $0xa0] sm:$0xff] %v1271_v14  ;;  %1370 = vst [vmem:[#allocation2 + $0xa8] sm:$0xff] %v1272_v39  ;;  %v1293_v50 = vmax.f32 %v4129_v12, 0.0  ;;  %v1295_v47 = vmax.f32 %v4130_v61, 0.0  ;;  %v1296_v57 = vmax.f32 %v3288_v49, 0.0  ;;  %v4131_v41 = vld [vmem:[#allocation13_spill] sm:$0xff] }
 0x28b   :  { %1371 = vst [vmem:[#allocation2 + $0xb0] sm:$0xff] %v1273_v34  ;;  %1372 = vst [vmem:[#allocation2 + $0xb8] sm:$0xff] %v1274_v4  ;;  %v1297_v45 = vmax.f32 %v4131_v41, 0.0  ;;  %v1298_v35 = vmax.f32 %v3296_v38, 0.0  ;;  %v4132_v9 = vld [vmem:[#allocation64_spill] sm:$0xff]  ;;  %v4133_v40 = vld [vmem:[#allocation15_spill] sm:$0xff] }
 0x28c   :  { %1373 = vst [vmem:[#allocation2 + $0xc0] sm:$0xff] %v1275_v20  ;;  %1374 = vst [vmem:[#allocation2 + $0xc8] sm:$0xff] %v1276_v10  ;;  %v1299_v29 = vmax.f32 %v4132_v9, 0.0  ;;  %v1300_v43 = vmax.f32 %v4133_v40, 0.0  ;;  %v4134_v11 = vld [vmem:[#allocation65_spill] sm:$0xff]  ;;  %v4136_v1 = vld [vmem:[#allocation66_spill] sm:$0xff] }
 0x28d   :  { %1375 = vst [vmem:[#allocation2 + $0xd0] sm:$0xff] %v1277_v3  ;;  %1376 = vst [vmem:[#allocation2 + $0xd8] sm:$0xff] %v1278_v8  ;;  %v1301_v13 = vmax.f32 %v4134_v11, 0.0  ;;  %v4135_v23 = vld [vmem:[#allocation17_spill] sm:$0xff]  ;;  %v1303_v6 = vmax.f32 %v4136_v1, 0.0  ;;  %v4137_v55 = vld [vmem:[#allocation19_spill] sm:$0xff] }
 0x28e   :  { %1377 = vst [vmem:[#allocation2 + $0xe0] sm:$0xff] %v1279_v48  ;;  %1378 = vst [vmem:[#allocation2 + $0xe8] sm:$0xff] %v1280_v7  ;;  %v1302_v49 = vmax.f32 %v4135_v23, 0.0  ;;  %v1304_v62 = vmax.f32 %v4137_v55, 0.0  ;;  %v4138_v2 = vld [vmem:[#allocation67_spill] sm:$0xff]  ;;  %v4139_v38 = vld [vmem:[#allocation21_spill] sm:$0xff] }
 0x28f   :  { %1379 = vst [vmem:[#allocation2 + $0xf0] sm:$0xff] %v1281_v46  ;;  %1380 = vst [vmem:[#allocation2 + $0xf8] sm:$0xff] %v1282_v44  ;;  %v1305_v36 = vmax.f32 %v4138_v2, 0.0  ;;  %v1306_v15 = vmax.f32 %v4139_v38, 0.0  ;;  %v4140_v52 = vld [vmem:[#allocation68_spill] sm:$0xff]  ;;  %v4141_v28 = vld [vmem:[#allocation23_spill] sm:$0xff] }
 0x290   :  { %1381 = vst [vmem:[#allocation2 + $0x100] sm:$0xff] %v1283_v37  ;;  %1382 = vst [vmem:[#allocation2 + $0x108] sm:$0xff] %v1284_v17  ;;  %v1307_v53 = vmax.f32 %v4140_v52, 0.0  ;;  %v1308_v0 = vmax.f32 %v4141_v28, 0.0  ;;  %v4142_v18 = vld [vmem:[#allocation69_spill] sm:$0xff]  ;;  %v4144_v27 = vld [vmem:[#allocation70_spill] sm:$0xff] }
 0x291   :  { %1383 = vst [vmem:[#allocation2 + $0x110] sm:$0xff] %v1285_v30  ;;  %1384 = vst [vmem:[#allocation2 + $0x118] sm:$0xff] %v1286_v54  ;;  %v1309_v60 = vmax.f32 %v4142_v18, 0.0  ;;  %v4143_v56 = vld [vmem:[#allocation25_spill] sm:$0xff]  ;;  %v1311_v14 = vmax.f32 %v4144_v27, 0.0  ;;  %v4145_v39 = vld [vmem:[#allocation27_spill] sm:$0xff] }
 0x292   :  { %1385 = vst [vmem:[#allocation2 + $0x120] sm:$0xff] %v1287_v63  ;;  %1386 = vst [vmem:[#allocation2 + $0x128] sm:$0xff] %v1288_v42  ;;  %v1310_v59 = vmax.f32 %v4143_v56, 0.0  ;;  %v1312_v34 = vmax.f32 %v4145_v39, 0.0  ;;  %v4146_v4 = vld [vmem:[#allocation71_spill] sm:$0xff]  ;;  %v4147_v10 = vld [vmem:[#allocation29_spill] sm:$0xff] }
 0x293   :  { %1387 = vst [vmem:[#allocation2 + $0x130] sm:$0xff] %v1289_v25  ;;  %1388 = vst [vmem:[#allocation2 + $0x138] sm:$0xff] %v1290_v16  ;;  %v1313_v20 = vmax.f32 %v4146_v4, 0.0  ;;  %v1314_v3 = vmax.f32 %v4147_v10, 0.0  ;;  %v4148_v8 = vld [vmem:[#allocation72_spill] sm:$0xff]  ;;  %v4149_v7 = vld [vmem:[#allocation31_spill] sm:$0xff] }
 0x294   :  { %1389 = vst [vmem:[#allocation2 + $0x140] sm:$0xff] %v1291_v33  ;;  %1390 = vst [vmem:[#allocation2 + $0x148] sm:$0xff] %v1292_v24  ;;  %v1315_v48 = vmax.f32 %v4148_v8, 0.0  ;;  %v1316_v46 = vmax.f32 %v4149_v7, 0.0  ;;  %v4150_v44 = vld [vmem:[#allocation73_spill] sm:$0xff]  ;;  %v4151_v17 = vld [vmem:[#allocation34_spill] sm:$0xff] }
 0x295   :  { %1391 = vst [vmem:[#allocation2 + $0x150] sm:$0xff] %v1293_v50  ;;  %1392 = vst [vmem:[#allocation2 + $0x158] sm:$0xff] %v1294_v58  ;;  %v1317_v37 = vmax.f32 %v4150_v44, 0.0  ;;  %v1318_v30 = vmax.f32 %v4151_v17, 0.0  ;;  %v4152_v54 = vld [vmem:[#allocation74_spill] sm:$0xff]  ;;  %v4153_v42 = vld [vmem:[#allocation37_spill] sm:$0xff] }
 0x296   :  { %1393 = vst [vmem:[#allocation2 + $0x160] sm:$0xff] %v1295_v47  ;;  %1394 = vst [vmem:[#allocation2 + $0x168] sm:$0xff] %v1296_v57  ;;  %v1319_v63 = vmax.f32 %v4152_v54, 0.0  ;;  %v1320_v25 = vmax.f32 %v4153_v42, 0.0  ;;  %v4154_v16 = vld [vmem:[#allocation75_spill] sm:$0xff]  ;;  %v4155_v24 = vld [vmem:[#allocation40_spill] sm:$0xff] }
 0x297   :  { %1395 = vst [vmem:[#allocation2 + $0x170] sm:$0xff] %v1297_v45  ;;  %1396 = vst [vmem:[#allocation2 + $0x178] sm:$0xff] %v1298_v35  ;;  %v1321_v33 = vmax.f32 %v4154_v16, 0.0  ;;  %v1322_v12 = vmax.f32 %v4155_v24, 0.0  ;;  %v4156_v50 = vld [vmem:[#allocation76_spill] sm:$0xff]  ;;  %v4157_v61 = vld [vmem:[#allocation43_spill] sm:$0xff] }
 0x298   :  { %1397 = vst [vmem:[#allocation2 + $0x180] sm:$0xff] %v1299_v29  ;;  %1398 = vst [vmem:[#allocation2 + $0x188] sm:$0xff] %v1300_v43  ;;  %v1323_v58 = vmax.f32 %v4156_v50, 0.0  ;;  %v1324_v47 = vmax.f32 %v4157_v61, 0.0  ;;  %v4158_v57 = vld [vmem:[#allocation77_spill] sm:$0xff]  ;;  %v4159_v45 = vld [vmem:[#allocation46_spill] sm:$0xff] }
 0x299   :  { %1399 = vst [vmem:[#allocation2 + $0x190] sm:$0xff] %v1301_v13  ;;  %1400 = vst [vmem:[#allocation2 + $0x198] sm:$0xff] %v1302_v49  ;;  %v1325_v41 = vmax.f32 %v4158_v57, 0.0  ;;  %v1326_v35 = vmax.f32 %v4159_v45, 0.0  ;;  %v4160_v9 = vld [vmem:[#allocation78_spill] sm:$0xff]  ;;  %v4161_v40 = vld [vmem:[#allocation49_spill] sm:$0xff] }
 0x29a   :  { %1401 = vst [vmem:[#allocation2 + $0x1a0] sm:$0xff] %v1303_v6  ;;  %1402 = vst [vmem:[#allocation2 + $0x1a8] sm:$0xff] %v1304_v62  ;;  %v1327_v29 = vmax.f32 %v4160_v9, 0.0  ;;  %v1328_v43 = vmax.f32 %v4161_v40, 0.0  ;;  %v4162_v11 = vld [vmem:[#allocation52_spill] sm:$0xff]  ;;  %v4163_v23 = vld [vmem:[#allocation55_spill] sm:$0xff] }
 0x29b   :  { %1403 = vst [vmem:[#allocation2 + $0x1b0] sm:$0xff] %v1305_v36  ;;  %1404 = vst [vmem:[#allocation2 + $0x1b8] sm:$0xff] %v1306_v15  ;;  %v1329_v13 = vmax.f32 %v4162_v11, 0.0  ;;  %v1330_v49 = vmax.f32 %v4163_v23, 0.0  ;;  %v4164_v1 = vld [vmem:[#allocation58_spill] sm:$0xff]  ;;  %v4165_v55 = vld [vmem:[#allocation32_spill] sm:$0xff] }
 0x29c   :  { %1405 = vst [vmem:[#allocation2 + $0x1c0] sm:$0xff] %v1307_v53  ;;  %1406 = vst [vmem:[#allocation2 + $0x1c8] sm:$0xff] %v1308_v0  ;;  %v1331_v6 = vmax.f32 %v4164_v1, 0.0  ;;  %v1332_v62 = vmax.f32 %v4165_v55, 0.0  ;;  %v4166_v2 = vld [vmem:[#allocation35_spill] sm:$0xff]  ;;  %v4167_v38 = vld [vmem:[#allocation38_spill] sm:$0xff] }
 0x29d   :  { %1407 = vst [vmem:[#allocation2 + $0x1d0] sm:$0xff] %v1309_v60  ;;  %1408 = vst [vmem:[#allocation2 + $0x1d8] sm:$0xff] %v1310_v59  ;;  %v1333_v36 = vmax.f32 %v4166_v2, 0.0  ;;  %v1334_v15 = vmax.f32 %v4167_v38, 0.0  ;;  %v4168_v52 = vld [vmem:[#allocation41_spill] sm:$0xff]  ;;  %v1336_v28 = vmax.f32 %v3448_v31, 0.0 }
 0x29e   :  { %1409 = vst [vmem:[#allocation2 + $0x1e0] sm:$0xff] %v1311_v14  ;;  %1410 = vst [vmem:[#allocation2 + $0x1e8] sm:$0xff] %v1312_v34  ;;  %v1335_v53 = vmax.f32 %v4168_v52, 0.0  ;;  %v1337_v0 = vmax.f32 %v3452_v32, 0.0  ;;  %v1338_v18 = vmax.f32 %v3456_v21, 0.0  ;;  %v1339_v60 = vmax.f32 %v3460_v26, 0.0 }
 0x29f   :  { %1411 = vst [vmem:[#allocation2 + $0x1f0] sm:$0xff] %v1313_v20  ;;  %1412 = vst [vmem:[#allocation2 + $0x1f8] sm:$0xff] %v1314_v3  ;;  %v1340_v56 = vmax.f32 %v3464_v22, 0.0  ;;  %v1341_v59 = vmax.f32 %v3468_v51, 0.0  ;;  %v4169_v27 = vld [vmem:[#allocation44_spill] sm:$0xff]  ;;  %v4170_v14 = vld [vmem:[#allocation47_spill] sm:$0xff] }
 0x2a0   :  { %1413 = vst [vmem:[#allocation2 + $0x200] sm:$0xff] %v1315_v48  ;;  %1414 = vst [vmem:[#allocation2 + $0x208] sm:$0xff] %v1316_v46  ;;  %v1342_v31 = vmax.f32 %v4169_v27, 0.0  ;;  %v1343_v32 = vmax.f32 %v4170_v14, 0.0  ;;  %v4171_v39 = vld [vmem:[#allocation50_spill] sm:$0xff]  ;;  %v4172_v4 = vld [vmem:[#allocation53_spill] sm:$0xff] }
 0x2a1   :  { %1415 = vst [vmem:[#allocation2 + $0x210] sm:$0xff] %v1317_v37  ;;  %1416 = vst [vmem:[#allocation2 + $0x218] sm:$0xff] %v1318_v30  ;;  %v1344_v34 = vmax.f32 %v4171_v39, 0.0  ;;  %v1345_v20 = vmax.f32 %v4172_v4, 0.0  ;;  %v1346_v21 = vmax.f32 %v3488_v5, 0.0  ;;  %v1347_v26 = vmax.f32 %v3492_v19, 0.0 }
 0x2a2   :  { %1417 = vst [vmem:[#allocation2 + $0x220] sm:$0xff] %v1319_v63  ;;  %1418 = vst [vmem:[#allocation2 + $0x228] sm:$0xff] %v1320_v25 }
 0x2a3   :  { %1419 = vst [vmem:[#allocation2 + $0x230] sm:$0xff] %v1321_v33  ;;  %1420 = vst [vmem:[#allocation2 + $0x238] sm:$0xff] %v1322_v12 }
 0x2a4   :  { %1421 = vst [vmem:[#allocation2 + $0x240] sm:$0xff] %v1323_v58  ;;  %1422 = vst [vmem:[#allocation2 + $0x248] sm:$0xff] %v1324_v47 }
 0x2a5   :  { %1423 = vst [vmem:[#allocation2 + $0x250] sm:$0xff] %v1325_v41  ;;  %1424 = vst [vmem:[#allocation2 + $0x258] sm:$0xff] %v1326_v35 }
 0x2a6   :  { %1425 = vst [vmem:[#allocation2 + $0x260] sm:$0xff] %v1327_v29  ;;  %1426 = vst [vmem:[#allocation2 + $0x268] sm:$0xff] %v1328_v43 }
 0x2a7   :  { %1427 = vst [vmem:[#allocation2 + $0x270] sm:$0xff] %v1329_v13  ;;  %1428 = vst [vmem:[#allocation2 + $0x278] sm:$0xff] %v1330_v49 }
 0x2a8   :  { %1429 = vst [vmem:[#allocation2 + $0x280] sm:$0xff] %v1331_v6  ;;  %1430 = vst [vmem:[#allocation2 + $0x288] sm:$0xff] %v1332_v62 }
 0x2a9   :  { %1431 = vst [vmem:[#allocation2 + $0x290] sm:$0xff] %v1333_v36  ;;  %1432 = vst [vmem:[#allocation2 + $0x298] sm:$0xff] %v1334_v15 }
 0x2aa   :  { %1433 = vst [vmem:[#allocation2 + $0x2a0] sm:$0xff] %v1335_v53  ;;  %1434 = vst [vmem:[#allocation2 + $0x2a8] sm:$0xff] %v1336_v28 }
 0x2ab   :  { %1435 = vst [vmem:[#allocation2 + $0x2b0] sm:$0xff] %v1337_v0  ;;  %1436 = vst [vmem:[#allocation2 + $0x2b8] sm:$0xff] %v1338_v18 }
 0x2ac   :  { %1437 = vst [vmem:[#allocation2 + $0x2c0] sm:$0xff] %v1339_v60  ;;  %1438 = vst [vmem:[#allocation2 + $0x2c8] sm:$0xff] %v1340_v56 }
 0x2ad   :  { %1439 = vst [vmem:[#allocation2 + $0x2d0] sm:$0xff] %v1341_v59  ;;  %1440 = vst [vmem:[#allocation2 + $0x2d8] sm:$0xff] %v1342_v31 }
 0x2ae   :  { %1441 = vst [vmem:[#allocation2 + $0x2e0] sm:$0xff] %v1343_v32  ;;  %1442 = vst [vmem:[#allocation2 + $0x2e8] sm:$0xff] %v1344_v34 }
 0x2af   :  { %1443 = vst [vmem:[#allocation2 + $0x2f0] sm:$0xff] %v1345_v20  ;;  %1444 = vst [vmem:[#allocation2 + $0x2f8] sm:$0xff] %v1346_v21 }
 0x2b0   :  { %1445 = vst [vmem:[#allocation2 + $0x300] sm:$0xff] %v1347_v26 }
 0x2b1   :  { %1548 = shalt.err (!%p1545_p4)
}
 0x2b2   :  { %s1549_s5 = scalar_lea.hbm %s3614_s4, 12544 }
 0x2b3   :  { %p1550_p5 = scmp.ne.s32.totalorder %s3614_s4, %s1549_s5  ;;  %p1553_p6 = scmp.lt.u32.totalorder %s1549_s5, %s3614_s4 }
 0x2b5   :  { %p1555_p7 = pnand %p1553_p6, %p1550_p5 }
 0x2b7   :  { %1558 = shalt.err (!%p1555_p7)
}
 0x2b8   :  { %s1564_s10 = smov 256   ;;  %s1565_s11 = smov 16  }
 0x2b9   :  { %1458 = dma.vmem_to_hbm [thread:$0]  %s3589_s3, 12544, %s3614_s4, [#allocation3], %s1564_s10, %s1564_s10, %s1565_s11  }
 0x2ba   :  { %1559 = dma.done.wait [#allocation3], 12544  }
 0x2bb   :  { %1560 = vsyncadd [#allocation3], 4294954752 }
 0x2bc   :  { %1462 = vsyncpa [#allocation3], 1 }

</bundles_post_ra>
